<compile_context>
chip_gen: v6e
topology: v6e:2x2x1
jax: 0.10.0
libtpu: 0.0.40
codegen_flags: <defaults>
</compile_context>

<pallas_src>
import jax
import jax.numpy as jnp
from jax.experimental import pallas as pl
from jax.experimental.pallas import tpu as pltpu


def _round_up(n, m):
    return ((n + m - 1) // m) * m


def _mxu_prefers_bf16():
    """bf16 MXU inputs on v6e / v7x; keep f32 on v5e and older (no bf16 VPU path)."""
    try:
        kind = jax.devices()[0].device_kind.lower()
    except Exception:
        return False
    return ("v6" in kind) or ("v7" in kind)


def policy_mlp_kernel(x_ref,
                      w1_ref, b1_ref,
                      w2_ref, b2_ref,
                      w3_ref, b3_ref,
                      w4_ref, b4_ref,
                      out_ref):
    # Compute dtype for MXU inputs follows the (wrapper-chosen) weight dtype:
    # bf16 on v6e/v7x, f32 on v5e. Accumulation is always f32.
    cdt = w1_ref.dtype

    # Layer 1: Linear + ReLU
    h = jnp.dot(x_ref[...].astype(cdt), w1_ref[...],
                preferred_element_type=jnp.float32)
    h = jnp.maximum(h + b1_ref[...], 0.0)
    # Layer 2: Linear + ReLU
    h = jnp.dot(h.astype(cdt), w2_ref[...], preferred_element_type=jnp.float32)
    h = jnp.maximum(h + b2_ref[...], 0.0)
    # Layer 3: Linear + ReLU
    h = jnp.dot(h.astype(cdt), w3_ref[...], preferred_element_type=jnp.float32)
    h = jnp.maximum(h + b3_ref[...], 0.0)
    # Layer 4: Linear (lane-padded to 128 outputs; padded lanes carry bias = -1e30)
    logits = jnp.dot(h.astype(cdt), w4_ref[...],
                     preferred_element_type=jnp.float32) + b4_ref[...]
    # Stable softmax over lanes. Padded lanes: exp(-1e30 - m) underflows to 0,
    # so they contribute nothing to the sum and store exact zeros.
    m = jnp.max(logits, axis=1, keepdims=True)
    e = jnp.exp(logits - m)
    denom = jnp.sum(e, axis=1, keepdims=True)
    out_ref[...] = e * pl.reciprocal(denom, approx=True)


def policy_model_forward(x, params, *, block_rows=256, use_bf16=None):
    """x: (B, input_size) f32. params: dict of (in,out) weights and (1,out) biases.

    Returns (B, output_size) f32 softmax probabilities (rows sum to 1)."""
    B, in_size = x.shape
    out_size = params["w4"].shape[1]
    if use_bf16 is None:
        use_bf16 = _mxu_prefers_bf16()

    # --- lane-dense output: pad last layer to a multiple of 128 output lanes ---
    out_pad = max(128, _round_up(out_size, 128))
    pad_cols = out_pad - out_size
    w4p = jnp.pad(params["w4"], ((0, 0), (0, pad_cols)))                       # zero cols
    b4p = jnp.pad(params["b4"], ((0, 0), (0, pad_cols)), constant_values=-1e30)  # -> exp==0

    # --- MXU input dtype (weights cast once here, outside the kernel) ---
    cdt = jnp.bfloat16 if use_bf16 else jnp.float32
    w1 = params["w1"].astype(cdt)
    w2 = params["w2"].astype(cdt)
    w3 = params["w3"].astype(cdt)
    w4 = w4p.astype(cdt)
    b1, b2, b3 = params["b1"], params["b2"], params["b3"]   # biases stay f32
    b4 = b4p

    # --- batch tiling: grid over row tiles, pad B so the grid divides evenly ---
    bt = min(block_rows, _round_up(B, 8))     # multiple of 8 (sublane constraint)
    padded_B = _round_up(B, bt)
    if padded_B != B:
        x = jnp.pad(x, ((0, padded_B - B), (0, 0)))   # zero rows -> harmless, sliced off
    grid = (padded_B // bt,)

    def resident(arr):
        # Constant index_map: same block every grid step -> DMA'd once, stays in VMEM.
        return pl.BlockSpec(arr.shape, lambda i: (0, 0))

    x_spec = pl.BlockSpec((bt, in_size), lambda i: (i, 0))
    out_spec = pl.BlockSpec((bt, out_pad), lambda i: (i, 0))

    args = (x, w1, b1, w2, b2, w3, b3, w4, b4)
    in_specs = [x_spec] + [resident(a) for a in args[1:]]

    out_padded = pl.pallas_call(
        policy_mlp_kernel,
        out_shape=jax.ShapeDtypeStruct((padded_B, out_pad), jnp.float32),
        grid_spec=pltpu.PrefetchScalarGridSpec(
            num_scalar_prefetch=0,
            grid=grid,
            in_specs=in_specs,
            out_specs=out_spec,
        ),
        compiler_params=pltpu.CompilerParams(
            dimension_semantics=("parallel",),   # shard batch tiles across TCs (v7x)
        ),
    )(*args)

    return out_padded[:B, :out_size]


def init_params(key, input_size, output_size, h1, h2, h3):
    """Deterministic init mimicking torch.nn.Linear (uniform +/- 1/sqrt(fan_in)),
    stored as (in, out) so the kernel uses y = x @ W + b."""
    dims = [(input_size, h1), (h1, h2), (h2, h3), (h3, output_size)]
    params = {}
    for i, (fan_in, fan_out) in enumerate(dims, start=1):
        key, kw, kb = jax.random.split(key, 3)
        bound = 1.0 / jnp.sqrt(jnp.float32(fan_in))
        params[f"w{i}"] = jax.random.uniform(
            kw, (fan_in, fan_out), jnp.float32, -bound, bound)
        params[f"b{i}"] = jax.random.uniform(
            kb, (1, fan_out), jnp.float32, -bound, bound)
    return params


def policy_model_reference(x, params):
    """Plain-JAX f32 reference for sanity checking."""
    h = jax.nn.relu(x @ params["w1"] + params["b1"])
    h = jax.nn.relu(h @ params["w2"] + params["b2"])
    h = jax.nn.relu(h @ params["w3"] + params["b3"])
    logits = h @ params["w4"] + params["b4"]
    return jax.nn.softmax(logits, axis=1)


if __name__ == "__main__":
    # Acrobot-v1: observation dim = 6, action dim = 3. Small hidden sizes.
    # Batch of stacked timesteps/envs (1000 -> non-multiple of the 256-row tile,
    # exercising the padding path and a 4-step parallel grid).
    input_size, output_size = 6, 3
    h1, h2, h3 = 64, 64, 32
    batch = 1000

    key = jax.random.PRNGKey(0)
    key, kx = jax.random.split(key)
    x = jax.random.normal(kx, (batch, input_size), dtype=jnp.float32)
    params = init_params(key, input_size, output_size, h1, h2, h3)

    use_bf16 = _mxu_prefers_bf16()
    out = policy_model_forward(x, params, use_bf16=use_bf16)
    out = jax.block_until_ready(out)

    ref = policy_model_reference(x, params)
    assert out.shape == (batch, output_size)
    # bf16 MXU inputs (v6e/v7x) and approx reciprocal relax the tolerance slightly.
    tol = 2e-2 if use_bf16 else 1e-3
    assert jnp.allclose(out, ref, atol=tol, rtol=tol), "mismatch vs reference"
    # rows sum to ~1 (softmax over dim=1; approx reciprocal -> tiny deviation)
    assert jnp.allclose(jnp.sum(out, axis=1), jnp.ones((batch,)), atol=1e-2)

    print("KERNEL_OK")
</pallas_src>

<mosaic_0001>
module attributes {stable_mosaic.version = 11 : i64} {
  func.func @policy_mlp_kernel(%arg0: i32, %arg1: memref<256x6xf32, #tpu.memory_space<vmem>>, %arg2: memref<6x64xf32, #tpu.memory_space<vmem>>, %arg3: memref<1x64xf32, #tpu.memory_space<vmem>>, %arg4: memref<64x64xf32, #tpu.memory_space<vmem>>, %arg5: memref<1x64xf32, #tpu.memory_space<vmem>>, %arg6: memref<64x32xf32, #tpu.memory_space<vmem>>, %arg7: memref<1x32xf32, #tpu.memory_space<vmem>>, %arg8: memref<32x128xf32, #tpu.memory_space<vmem>>, %arg9: memref<1x128xf32, #tpu.memory_space<vmem>>, %arg10: memref<256x128xf32, #tpu.memory_space<vmem>>) attributes {dimension_semantics = [#tpu.dimension_semantics<parallel>], iteration_bounds = array<i64: 4>, scalar_prefetch = 0 : i64, scratch_operands = 0 : i64, tpu.core_type = #tpu.core_type<tc>, window_params = [{transform_indices = @transform_0, window_bounds = array<i64: 256, 6>}, {pipeline_mode = #tpu.pipeline_mode<synchronous>, transform_indices = @transform_1, window_bounds = array<i64: 6, 64>}, {pipeline_mode = #tpu.pipeline_mode<synchronous>, transform_indices = @transform_2, window_bounds = array<i64: 1, 64>}, {pipeline_mode = #tpu.pipeline_mode<synchronous>, transform_indices = @transform_3, window_bounds = array<i64: 64, 64>}, {pipeline_mode = #tpu.pipeline_mode<synchronous>, transform_indices = @transform_4, window_bounds = array<i64: 1, 64>}, {pipeline_mode = #tpu.pipeline_mode<synchronous>, transform_indices = @transform_5, window_bounds = array<i64: 64, 32>}, {pipeline_mode = #tpu.pipeline_mode<synchronous>, transform_indices = @transform_6, window_bounds = array<i64: 1, 32>}, {pipeline_mode = #tpu.pipeline_mode<synchronous>, transform_indices = @transform_7, window_bounds = array<i64: 32, 128>}, {pipeline_mode = #tpu.pipeline_mode<synchronous>, transform_indices = @transform_8, window_bounds = array<i64: 1, 128>}, {transform_indices = @transform_9, window_bounds = array<i64: 256, 128>}]} {
    %c0 = arith.constant 0 : index
    %c0_0 = arith.constant 0 : index
    %0 = vector.load %arg1[%c0, %c0_0] : memref<256x6xf32, #tpu.memory_space<vmem>>, vector<256x6xf32>
    %c0_1 = arith.constant 0 : index
    %c0_2 = arith.constant 0 : index
    %1 = vector.load %arg2[%c0_1, %c0_2] : memref<6x64xf32, #tpu.memory_space<vmem>>, vector<6x64xf32>
    %cst = arith.constant dense<0.000000e+00> : vector<256x64xf32>
    %2 = tpu.matmul %0, %1, %cst {dimension_numbers = #tpu.dot_dimension_numbers<[1], [0], [0], [1], [0, 0, 1, 1], [], []>} : vector<256x6xf32>, vector<6x64xf32>, vector<256x64xf32> -> vector<256x64xf32>
    %c0_3 = arith.constant 0 : index
    %c0_4 = arith.constant 0 : index
    %3 = vector.load %arg3[%c0_3, %c0_4] : memref<1x64xf32, #tpu.memory_space<vmem>>, vector<1x64xf32>
    %4 = vector.broadcast %3 : vector<1x64xf32> to vector<256x64xf32>
    %5 = arith.addf %2, %4 : vector<256x64xf32>
    %cst_5 = arith.constant 0.000000e+00 : f32
    %6 = vector.broadcast %cst_5 : f32 to vector<256x64xf32>
    %7 = arith.maximumf %5, %6 : vector<256x64xf32>
    %c0_6 = arith.constant 0 : index
    %c0_7 = arith.constant 0 : index
    %8 = vector.load %arg4[%c0_6, %c0_7] : memref<64x64xf32, #tpu.memory_space<vmem>>, vector<64x64xf32>
    %cst_8 = arith.constant dense<0.000000e+00> : vector<256x64xf32>
    %9 = tpu.matmul %7, %8, %cst_8 {dimension_numbers = #tpu.dot_dimension_numbers<[1], [0], [0], [1], [0, 0, 1, 1], [], []>} : vector<256x64xf32>, vector<64x64xf32>, vector<256x64xf32> -> vector<256x64xf32>
    %c0_9 = arith.constant 0 : index
    %c0_10 = arith.constant 0 : index
    %10 = vector.load %arg5[%c0_9, %c0_10] : memref<1x64xf32, #tpu.memory_space<vmem>>, vector<1x64xf32>
    %11 = vector.broadcast %10 : vector<1x64xf32> to vector<256x64xf32>
    %12 = arith.addf %9, %11 : vector<256x64xf32>
    %cst_11 = arith.constant 0.000000e+00 : f32
    %13 = vector.broadcast %cst_11 : f32 to vector<256x64xf32>
    %14 = arith.maximumf %12, %13 : vector<256x64xf32>
    %c0_12 = arith.constant 0 : index
    %c0_13 = arith.constant 0 : index
    %15 = vector.load %arg6[%c0_12, %c0_13] : memref<64x32xf32, #tpu.memory_space<vmem>>, vector<64x32xf32>
    %cst_14 = arith.constant dense<0.000000e+00> : vector<256x32xf32>
    %16 = tpu.matmul %14, %15, %cst_14 {dimension_numbers = #tpu.dot_dimension_numbers<[1], [0], [0], [1], [0, 0, 1, 1], [], []>} : vector<256x64xf32>, vector<64x32xf32>, vector<256x32xf32> -> vector<256x32xf32>
    %c0_15 = arith.constant 0 : index
    %c0_16 = arith.constant 0 : index
    %17 = vector.load %arg7[%c0_15, %c0_16] : memref<1x32xf32, #tpu.memory_space<vmem>>, vector<1x32xf32>
    %18 = vector.broadcast %17 : vector<1x32xf32> to vector<256x32xf32>
    %19 = arith.addf %16, %18 : vector<256x32xf32>
    %cst_17 = arith.constant 0.000000e+00 : f32
    %20 = vector.broadcast %cst_17 : f32 to vector<256x32xf32>
    %21 = arith.maximumf %19, %20 : vector<256x32xf32>
    %c0_18 = arith.constant 0 : index
    %c0_19 = arith.constant 0 : index
    %22 = vector.load %arg8[%c0_18, %c0_19] : memref<32x128xf32, #tpu.memory_space<vmem>>, vector<32x128xf32>
    %cst_20 = arith.constant dense<0.000000e+00> : vector<256x128xf32>
    %23 = tpu.matmul %21, %22, %cst_20 {dimension_numbers = #tpu.dot_dimension_numbers<[1], [0], [0], [1], [0, 0, 1, 1], [], []>} : vector<256x32xf32>, vector<32x128xf32>, vector<256x128xf32> -> vector<256x128xf32>
    %c0_21 = arith.constant 0 : index
    %c0_22 = arith.constant 0 : index
    %24 = vector.load %arg9[%c0_21, %c0_22] : memref<1x128xf32, #tpu.memory_space<vmem>>, vector<1x128xf32>
    %25 = vector.broadcast %24 : vector<1x128xf32> to vector<256x128xf32>
    %26 = arith.addf %23, %25 : vector<256x128xf32>
    %cst_23 = arith.constant dense<0xFF800000> : vector<256xf32>
    %27 = vector.multi_reduction <maximumf>, %26, %cst_23 [1] : vector<256x128xf32> to vector<256xf32>
    %28 = vector.shape_cast %27 : vector<256xf32> to vector<256x1xf32>
    %29 = vector.broadcast %28 : vector<256x1xf32> to vector<256x128xf32>
    %30 = arith.subf %26, %29 : vector<256x128xf32>
    %31 = math.exp %30 : vector<256x128xf32>
    %cst_24 = arith.constant dense<0.000000e+00> : vector<256xf32>
    %32 = vector.multi_reduction <add>, %31, %cst_24 [1] : vector<256x128xf32> to vector<256xf32>
    %33 = vector.shape_cast %32 : vector<256xf32> to vector<256x1xf32>
    %34 = tpu.reciprocal %33 {approx = true} : vector<256x1xf32> -> vector<256x1xf32>
    %35 = vector.broadcast %34 : vector<256x1xf32> to vector<256x128xf32>
    %36 = arith.mulf %31, %35 : vector<256x128xf32>
    %c0_25 = arith.constant 0 : index
    %c0_26 = arith.constant 0 : index
    %37 = vector.load %arg10[%c0_25, %c0_26] : memref<256x128xf32, #tpu.memory_space<vmem>>, vector<256x128xf32>
    tpu.vector_store %arg10[%c0_25, %c0_26], %36 {strides = array<i32>} : memref<256x128xf32, #tpu.memory_space<vmem>>, vector<256x128xf32>,
    return
  }
  func.func @transform_0(%arg0: i32) -> (i32, i32) {
    %c0_i32 = arith.constant 0 : i32
    %c0_i32_0 = arith.constant 0 : i32
    return %arg0, %c0_i32 : i32, i32
  }
  func.func @transform_1(%arg0: i32) -> (i32, i32) {
    %c0_i32 = arith.constant 0 : i32
    %c0_i32_0 = arith.constant 0 : i32
    %c0_i32_1 = arith.constant 0 : i32
    return %c0_i32, %c0_i32_0 : i32, i32
  }
  func.func @transform_2(%arg0: i32) -> (i32, i32) {
    %c0_i32 = arith.constant 0 : i32
    %c0_i32_0 = arith.constant 0 : i32
    %c0_i32_1 = arith.constant 0 : i32
    return %c0_i32, %c0_i32_0 : i32, i32
  }
  func.func @transform_3(%arg0: i32) -> (i32, i32) {
    %c0_i32 = arith.constant 0 : i32
    %c0_i32_0 = arith.constant 0 : i32
    %c0_i32_1 = arith.constant 0 : i32
    return %c0_i32, %c0_i32_0 : i32, i32
  }
  func.func @transform_4(%arg0: i32) -> (i32, i32) {
    %c0_i32 = arith.constant 0 : i32
    %c0_i32_0 = arith.constant 0 : i32
    %c0_i32_1 = arith.constant 0 : i32
    return %c0_i32, %c0_i32_0 : i32, i32
  }
  func.func @transform_5(%arg0: i32) -> (i32, i32) {
    %c0_i32 = arith.constant 0 : i32
    %c0_i32_0 = arith.constant 0 : i32
    %c0_i32_1 = arith.constant 0 : i32
    return %c0_i32, %c0_i32_0 : i32, i32
  }
  func.func @transform_6(%arg0: i32) -> (i32, i32) {
    %c0_i32 = arith.constant 0 : i32
    %c0_i32_0 = arith.constant 0 : i32
    %c0_i32_1 = arith.constant 0 : i32
    return %c0_i32, %c0_i32_0 : i32, i32
  }
  func.func @transform_7(%arg0: i32) -> (i32, i32) {
    %c0_i32 = arith.constant 0 : i32
    %c0_i32_0 = arith.constant 0 : i32
    %c0_i32_1 = arith.constant 0 : i32
    return %c0_i32, %c0_i32_0 : i32, i32
  }
  func.func @transform_8(%arg0: i32) -> (i32, i32) {
    %c0_i32 = arith.constant 0 : i32
    %c0_i32_0 = arith.constant 0 : i32
    %c0_i32_1 = arith.constant 0 : i32
    return %c0_i32, %c0_i32_0 : i32, i32
  }
  func.func @transform_9(%arg0: i32) -> (i32, i32) {
    %c0_i32 = arith.constant 0 : i32
    %c0_i32_0 = arith.constant 0 : i32
    return %arg0, %c0_i32 : i32, i32
  }
}

</mosaic_0001>

<bundles_post_ra>
// kernel: tpu_custom_call.1
= control target key start
LH: loop header
LB: loop body
LE: loop exit
PB: predicated region body
PF: predicated region fallthrough
CT: control target
= control target key end

     0   :  { %14 = vsyncpa [#allocation3], 0  ;;  %s3788_s0 = inlined_call_operand.vmem [shape: f32[1024,6], index: 0, kind: input, shape index: {}]   ;;  %s3789_s1 = inlined_call_operand.vmem [shape: f32[6,64], index: 1, kind: input, shape index: {}]   ;;  %s3790_s2 = inlined_call_operand.vmem [shape: f32[1,64], index: 2, kind: input, shape index: {}]   ;;  %s3791_s3 = inlined_call_operand.vmem [shape: f32[64,64], index: 3, kind: input, shape index: {}]   ;;  %s3792_s4 = inlined_call_operand.vmem [shape: f32[1,64], index: 4, kind: input, shape index: {}]   ;;  %s3793_s5 = inlined_call_operand.vmem [shape: f32[64,32], index: 5, kind: input, shape index: {}]   ;;  %s3794_s6 = inlined_call_operand.vmem [shape: f32[1,32], index: 6, kind: input, shape index: {}]   ;;  %s3795_s7 = inlined_call_operand.vmem [shape: f32[32,128], index: 7, kind: input, shape index: {}]   ;;  %s3796_s8 = inlined_call_operand.vmem [shape: f32[1,128], index: 8, kind: input, shape index: {}]   ;;  %s3797_s9 = inlined_call_operand.hbm [shape: f32[1024,128], index: 9, kind: output, shape index: {}]  }
   0x1   :  { %16 = vsyncpa [#allocation3 + $0x1], 0  ;;  %s3019_s30 = smov 0   ;;  %s3021_s10 = smov 0  }
   0x2   :  { %s3023_s11 = smov 0   ;;  %s3025_s12 = smov 0  }
   0x3 LB: > { %s3040_s13 = sadd.s32 4294967295, %s2964_s12   ;;  %s2198_s14 = sadd.s32 4294967294, %s2964_s12   ;;  %s2964_s12 = sphi %s3025_s12, %s3803_s12   ;;  %s2960_s11 = sphi %s3023_s11, %s3802_s11   ;;  %s2956_s10 = sphi %s3021_s10, %s3801_s10   ;;  %s2952_s30 = sphi %s3019_s30, %s3800_s30  }
   0x4   : > { %s3044_s15 = sadd.s32 1, %s2964_s12   ;;  %s223_s16 = sadd.s32 1, %s2960_s11 }
   0x5   : > { %s220_s17 = ssub.s32 %s2964_s12, %s3044_s15  ;;  %p233_p0 = scmp.ne.s32.totalorder %s2960_s11, %s2956_s10 }
   0x6   : > { %p221_p1 = scmp.eq.s32.totalorder %s220_s17, 0  ;;  %p234_p2 = scmp.eq.s32.totalorder %s3040_s13, 3 }
   0x7   : > { %p239_p3 = scmp.ne.s32.totalorder %s2956_s10, %s2952_s30  ;;  %p240_p4 = scmp.eq.s32.totalorder %s2198_s14, 3 }
   0x8   : > { %s3055_s18 = scalar_select %p221_p1, %s2960_s11, %s223_s16  }
   0x9   : > { %p3057_p5 = por %p234_p2, %p233_p0  ;;  %p3061_p6 = por %p240_p4, %p239_p3 }
   0xa   : > { %p2201_p7 = scmp.ge.s32.totalorder %s2964_s12, 1  ;;  %p291_p8 = scmp.lt.s32.totalorder %s2964_s12, 5 }
   0xc   : > { %p292_p9 = pnand %p2201_p7, %p291_p8 }
   0xd   : > { %s2203_s23 = sshll.u32 (!%p292_p9), %s3040_s13, 5  ;;  %s324_s28 = sand.u32 (!%p292_p9), 1, %s2956_s10  }
   0xe   : > { %295 = sbr.rel (%p292_p9) target bundleno = 1208 (0x4b8), region = 56  ;;  %p328_p10 = scmp.lt.s32.totalorder (!%p292_p9), %s2203_s23, 127 }
   0xf   : > { %s2202_s29 = sshll.u32 (!%p292_p9), %s324_s28, 8  ;;  %s2343_s16 = sshll.u32 (!%p292_p9), %s3040_s13, 12 }
  0x10   : > { %s3672_s14 = scalar_lea.vmem (!%p292_p9), [#allocation2], %s2202_s29  ;;  %s3748_s13 = scalar_lea.sflag (!%p292_p9), [#allocation3], %s324_s28 }
  0x11   : > { %s2966_s25 = smov (!%p292_p9), [#allocation2]  }
  0x12   : > { %s2908_s26 = sshll.u32 (!%p292_p9), %s2966_s25, 4  ;;  %s2909_s26 = int_to_ptr.vmem [resolvable:$false] %s2908_s26 }
  0x13   : > { %v366_v0 = vld [vmem:[%s3789_s1] sm:$0x3f]  ;;  %vm471_vm0 = vcmask 1045504   ;;  %v739_v1 = vld [vmem:[%s3791_s3 + $0x38] sm:$0xff]  ;;  %v738_v2 = vld [vmem:[%s3791_s3 + $0x30] sm:$0xff]  ;;  %s3805_s23 = smov (!%p328_p10, %s2203_s23), 127 }
  0x14   : > { %2493 = vmatprep.subr.msk.mxu0 %vm471_vm0, %v366_v0  ;;  %2543 = vmatprep.subr.mxu1 %v739_v1  ;;  %v737_v3 = vld [vmem:[%s3791_s3 + $0x28] sm:$0xff]  ;;  %v736_v4 = vld [vmem:[%s3791_s3 + $0x20] sm:$0xff]  ;;  %s2204_s17 = sshll.u32 %s3805_s23, 3  ;;  %vm374_vm1 = vcmask 48128   ;;  %v735_v37 = vld [vmem:[%s3791_s3 + $0x18] sm:$0xff]  ;;  %vm747_vm2 = vcmask 523264  }
  0x15   : > { %2494 = vmatpush3.msk.msra.mxu0 %vm471_vm0, %v366_v0  ;;  %2544 = vmatpush3.msra.mxu1 %v739_v1  ;;  %s3086_s24 = scalar_lea.vmem %s3788_s0, %s2204_s17  ;;  %v734_v38 = vld [vmem:[%s3791_s3 + $0x10] sm:$0xff]  ;;  %v733_v39 = vld [vmem:[%s3791_s3 + $0x8] sm:$0xff]  ;;  %v732_v40 = vld [vmem:[%s3791_s3] sm:$0xff]  ;;  %vm1480_vm3 = vcmask 261120   ;;  %s2136_s17 = sshll.u32 %s3672_s14, 4  ;;  %s3741_s17 = int_to_ptr.vmem [resolvable:$true] %s2136_s17 }
  0x16   : > { %2545 = vmatprep.subr.mxu1 %v738_v2  ;;  %v334_v5 = vld [vmem:[%s3086_s24] sm:$0xff]  ;;  %v335_v6 = vld [vmem:[%s3086_s24 + $0x8] sm:$0xff]  ;;  %v336_v7 = vld [vmem:[%s3086_s24 + $0x10] sm:$0xff]  ;;  %s2904_s23 = scalar_lea.vmem %s3741_s17, 4096  ;;  %s2910_s27 = scalar_lea.vmem %s2909_s26, 8192 }
  0x17   : > { %2546 = vmatpush3.msra.mxu1 %v738_v2  ;;  %2495 = vmatprep.mubr.msk.f32.mxu0 %vm374_vm1, %v334_v5  ;;  %v337_v8 = vld [vmem:[%s3086_s24 + $0x18] sm:$0xff]  ;;  %v338_v9 = vld [vmem:[%s3086_s24 + $0x20] sm:$0xff]  ;;  %v339_v10 = vld [vmem:[%s3086_s24 + $0x28] sm:$0xff]  ;;  %p2905_p11 = scmp.ne.s32.totalorder %s3741_s17, %s2904_s23  ;;  %p2911_p0 = scmp.lt.s32.totalorder %s3741_s17, %s2909_s26 }
  0x18   : > { %2547 = vmatprep.subr.mxu1 %v737_v3  ;;  %2496 = vmatmul.mubr.msk.f32.vlgmr.msra.gmra.mxu0 %vm374_vm1, %v335_v6  ;;  %v340_v11 = vld [vmem:[%s3086_s24 + $0x30] sm:$0xff]  ;;  %v341_v12 = vld [vmem:[%s3086_s24 + $0x38] sm:$0xff]  ;;  %v342_v13 = vld [vmem:[%s3086_s24 + $0x40] sm:$0xff]  ;;  %p2912_p1 = scmp.lt.s32.totalorder %s2910_s27, %s2904_s23 }
  0x19   : > { %2548 = vmatpush3.msra.mxu1 %v737_v3  ;;  %2498 = vmatprep.mubr.msk.f32.mxu0 %vm374_vm1, %v336_v7  ;;  %v343_v14 = vld [vmem:[%s3086_s24 + $0x48] sm:$0xff]  ;;  %v344_v15 = vld [vmem:[%s3086_s24 + $0x50] sm:$0xff]  ;;  %v345_v16 = vld [vmem:[%s3086_s24 + $0x58] sm:$0xff]  ;;  %p2906_p12 = pnand %p2905_p11, %p3057_p5 }
  0x1a   : > { %2549 = vmatprep.subr.mxu1 %v736_v4  ;;  %v346_v17 = vld [vmem:[%s3086_s24 + $0x60] sm:$0xff]  ;;  %v347_v18 = vld [vmem:[%s3086_s24 + $0x68] sm:$0xff]  ;;  %v348_v19 = vld [vmem:[%s3086_s24 + $0x70] sm:$0xff]  ;;  %p2913_p2 = por %p2912_p1, %p2911_p0 }
  0x1b   : > { %2550 = vmatpush3.msra.mxu1 %v736_v4  ;;  %v349_v20 = vld [vmem:[%s3086_s24 + $0x78] sm:$0xff]  ;;  %v350_v21 = vld [vmem:[%s3086_s24 + $0x80] sm:$0xff]  ;;  %v351_v22 = vld [vmem:[%s3086_s24 + $0x88] sm:$0xff]  ;;  %p2907_p13 = pneg %p2906_p12 }
  0x1c   : > { %2499 = vmatmul.mubr.msk.f32.gmra.mxu0 %vm374_vm1, %v337_v8  ;;  %v352_v23 = vld [vmem:[%s3086_s24 + $0x90] sm:$0xff]  ;;  %v353_v24 = vld [vmem:[%s3086_s24 + $0x98] sm:$0xff]  ;;  %v354_v25 = vld [vmem:[%s3086_s24 + $0xa0] sm:$0xff]  ;;  %2551 = vmatprep.subr.mxu1 %v735_v37 }
  0x1d   : > { %2501 = vmatprep.mubr.msk.f32.mxu0 %vm374_vm1, %v338_v9  ;;  %v355_v26 = vld [vmem:[%s3086_s24 + $0xa8] sm:$0xff]  ;;  %v356_v27 = vld [vmem:[%s3086_s24 + $0xb0] sm:$0xff]  ;;  %v357_v28 = vld [vmem:[%s3086_s24 + $0xb8] sm:$0xff]  ;;  %2552 = vmatpush3.msra.mxu1 %v735_v37  ;;  %p2914_p3 = pnand %p2913_p2, %p2907_p13 }
  0x1e   : > { %v358_v29 = vld [vmem:[%s3086_s24 + $0xc0] sm:$0xff]  ;;  %v359_v30 = vld [vmem:[%s3086_s24 + $0xc8] sm:$0xff]  ;;  %v360_v31 = vld [vmem:[%s3086_s24 + $0xd0] sm:$0xff]  ;;  %2553 = vmatprep.subr.mxu1 %v734_v38 }
  0x1f   : > { %v361_v32 = vld [vmem:[%s3086_s24 + $0xd8] sm:$0xff]  ;;  %v362_v33 = vld [vmem:[%s3086_s24 + $0xe0] sm:$0xff]  ;;  %v363_v34 = vld [vmem:[%s3086_s24 + $0xe8] sm:$0xff]  ;;  %2554 = vmatpush3.msra.mxu1 %v734_v38 }
  0x20   : > { %2502 = vmatmul.mubr.msk.f32.gmra.mxu0 %vm374_vm1, %v339_v10  ;;  %v364_v35 = vld [vmem:[%s3086_s24 + $0xf0] sm:$0xff]  ;;  %v365_v36 = vld [vmem:[%s3086_s24 + $0xf8] sm:$0xff]  ;;  %2555 = vmatprep.subr.mxu1 %v733_v39  ;;  %v1106_v43 = vld [vmem:[%s3793_s5 + $0x28] sm:$0xff]  ;;  %s3739_s24 = scalar_lea.hbm %s3797_s9, %s2343_s16 }
  0x21   : > { %2504 = vmatprep.mubr.msk.f32.mxu0 %vm374_vm1, %v340_v11  ;;  %2556 = vmatpush3.msra.mxu1 %v733_v39  ;;  %v1108_v41 = vld [vmem:[%s3793_s5 + $0x38] sm:$0xff]  ;;  %v1107_v42 = vld [vmem:[%s3793_s5 + $0x30] sm:$0xff]  ;;  %v1105_v44 = vld [vmem:[%s3793_s5 + $0x20] sm:$0xff] }
  0x22   : > { %2557 = vmatprep.subr.mxu1 %v732_v40  ;;  %2607 = vmatprep.subr.mxu0 %v1108_v41  ;;  %v1104_v45 = vld [vmem:[%s3793_s5 + $0x18] sm:$0xff]  ;;  %v1103_v46 = vld [vmem:[%s3793_s5 + $0x10] sm:$0xff]  ;;  %v1102_v47 = vld [vmem:[%s3793_s5 + $0x8] sm:$0xff] }
  0x23   : > { %2558 = vmatpush3.msra.mxu1 %v732_v40  ;;  %2608 = vmatpush3.msra.mxu0 %v1108_v41  ;;  %v1101_v48 = vld [vmem:[%s3793_s5] sm:$0xff] }
  0x24   : > { %2505 = vmatmul.mubr.msk.f32.gmra.mxu0 %vm374_vm1, %v341_v12  ;;  %2609 = vmatprep.subr.mxu0 %v1107_v42  ;;  %v3191_v49 = vld [vmem:[%s3790_s2] ss:$0 sm:$0xff] }
  0x25   : > { %2507 = vmatprep.mubr.msk.f32.mxu0 %vm374_vm1, %v342_v13  ;;  %2610 = vmatpush3.msra.mxu0 %v1107_v42 }
  0x26   : > { %2611 = vmatprep.subr.mxu0 %v1106_v43 }
  0x27   : > { %2612 = vmatpush3.msra.mxu0 %v1106_v43 }
  0x28   : > { %2508 = vmatmul.mubr.msk.f32.gmra.mxu0 %vm374_vm1, %v343_v14  ;;  %2613 = vmatprep.subr.mxu0 %v1105_v44 }
  0x29   : > { %2510 = vmatprep.mubr.msk.f32.mxu0 %vm374_vm1, %v344_v15  ;;  %2614 = vmatpush3.msra.mxu0 %v1105_v44 }
  0x2a   : > { %2615 = vmatprep.subr.mxu0 %v1104_v45 }
  0x2b   : > { %2616 = vmatpush3.msra.mxu0 %v1104_v45 }
  0x2c   : > { %2511 = vmatmul.mubr.msk.f32.gmra.mxu0 %vm374_vm1, %v345_v16  ;;  %2617 = vmatprep.subr.mxu0 %v1103_v46 }
  0x2d   : > { %2513 = vmatprep.mubr.msk.f32.mxu0 %vm374_vm1, %v346_v17  ;;  %2618 = vmatpush3.msra.mxu0 %v1103_v46 }
  0x2e   : > { %2619 = vmatprep.subr.mxu0 %v1102_v47 }
  0x2f   : > { %2620 = vmatpush3.msra.mxu0 %v1102_v47 }
  0x30   : > { %2514 = vmatmul.mubr.msk.f32.gmra.mxu0 %vm374_vm1, %v347_v18  ;;  %2621 = vmatprep.subr.mxu0 %v1101_v48 }
  0x31   : > { %2516 = vmatprep.mubr.msk.f32.mxu0 %vm374_vm1, %v348_v19  ;;  %2622 = vmatpush3.msra.mxu0 %v1101_v48 }
  0x34   : > { %2517 = vmatmul.mubr.msk.f32.gmra.mxu0 %vm374_vm1, %v349_v20 }
  0x35   : > { %2519 = vmatprep.mubr.msk.f32.mxu0 %vm374_vm1, %v350_v21 }
  0x38   : > { %2520 = vmatmul.mubr.msk.f32.gmra.mxu0 %vm374_vm1, %v351_v22 }
  0x39   : > { %2522 = vmatprep.mubr.msk.f32.mxu0 %vm374_vm1, %v352_v23 }
  0x3c   : > { %2523 = vmatmul.mubr.msk.f32.gmra.mxu0 %vm374_vm1, %v353_v24 }
  0x3d   : > { %2525 = vmatprep.mubr.msk.f32.mxu0 %vm374_vm1, %v354_v25 }
  0x40   : > { %2526 = vmatmul.mubr.msk.f32.gmra.mxu0 %vm374_vm1, %v355_v26 }
  0x41   : > { %2528 = vmatprep.mubr.msk.f32.mxu0 %vm374_vm1, %v356_v27 }
  0x44   : > { %2529 = vmatmul.mubr.msk.f32.gmra.mxu0 %vm374_vm1, %v357_v28 }
  0x45   : > { %2531 = vmatprep.mubr.msk.f32.mxu0 %vm374_vm1, %v358_v29 }
  0x48   : > { %2532 = vmatmul.mubr.msk.f32.gmra.mxu0 %vm374_vm1, %v359_v30 }
  0x49   : > { %2534 = vmatprep.mubr.msk.f32.mxu0 %vm374_vm1, %v360_v31 }
  0x4c   : > { %2535 = vmatmul.mubr.msk.f32.gmra.mxu0 %vm374_vm1, %v361_v32 }
  0x4d   : > { %2537 = vmatprep.mubr.msk.f32.mxu0 %vm374_vm1, %v362_v33 }
  0x50   : > { %2538 = vmatmul.mubr.msk.f32.gmra.mxu0 %vm374_vm1, %v363_v34 }
  0x51   : > { %2540 = vmatprep.mubr.msk.f32.mxu0 %vm374_vm1, %v364_v35 }
  0x54   : > { %2541 = vmatmul.mubr.msk.f32.gmra.mxu0 %vm374_vm1, %v365_v36 }
  0xd8   : > { %v2497_v50 = vpop.f32.mrf.mxu0 }
  0xd9   : > { %v547_v51 = vadd.f32 %v2497_v50, %v3191_v49 }
  0xda   : > { %v541_v52 = vpop.f32.mrf.mxu0 }
  0xdb   : > { %v542_v53 = vadd.f32 %v3191_v49, %v541_v52  ;;  %v701_v56 = vmax.f32 %v547_v51, 0.0 }
  0xdc   : > { %v2500_v54 = vpop.f32.mrf.mxu0 }
  0xdd   : > { %v700_v55 = vmax.f32 %v542_v53, 0.0  ;;  %v557_v57 = vadd.f32 %v2500_v54, %v3191_v49 }
  0xde   : > { %v551_v58 = vpop.f32.mrf.mxu0 }
  0xdf   : > { %v552_v59 = vadd.f32 %v3191_v49, %v551_v58  ;;  %2559 = vmatprep.mubr.msk.f32.mxu1 %vm747_vm2, %v700_v55  ;;  %v703_v63 = vmax.f32 %v557_v57, 0.0 }
  0xe0   : > { %v2503_v60 = vpop.f32.mrf.mxu0  ;;  %2560 = vmatmul.mubr.msk.f32.vlgmr.msra.gmra.mxu1 %vm747_vm2, %v701_v56 }
  0xe1   : > { %v702_v61 = vmax.f32 %v552_v59, 0.0  ;;  %v567_v62 = vadd.f32 %v2503_v60, %v3191_v49 }
  0xe2   : > { %v561_v0 = vpop.f32.mrf.mxu0 }
  0xe3   : > { %v562_v1 = vadd.f32 %v3191_v49, %v561_v0  ;;  %2562 = vmatprep.mubr.msk.f32.mxu1 %vm747_vm2, %v702_v61  ;;  %v705_v2 = vmax.f32 %v567_v62, 0.0 }
  0xe4   : > { %v2506_v3 = vpop.f32.mrf.mxu0  ;;  %2563 = vmatmul.mubr.msk.f32.gmra.mxu1 %vm747_vm2, %v703_v63 }
  0xe5   : > { %v704_v4 = vmax.f32 %v562_v1, 0.0  ;;  %v577_v5 = vadd.f32 %v2506_v3, %v3191_v49 }
  0xe6   : > { %v571_v6 = vpop.f32.mrf.mxu0 }
  0xe7   : > { %v572_v7 = vadd.f32 %v3191_v49, %v571_v6  ;;  %2565 = vmatprep.mubr.msk.f32.mxu1 %vm747_vm2, %v704_v4  ;;  %v707_v8 = vmax.f32 %v577_v5, 0.0 }
  0xe8   : > { %v2509_v9 = vpop.f32.mrf.mxu0  ;;  %2566 = vmatmul.mubr.msk.f32.gmra.mxu1 %vm747_vm2, %v705_v2 }
  0xe9   : > { %v706_v10 = vmax.f32 %v572_v7, 0.0  ;;  %v587_v11 = vadd.f32 %v2509_v9, %v3191_v49 }
  0xea   : > { %v581_v12 = vpop.f32.mrf.mxu0 }
  0xeb   : > { %v582_v13 = vadd.f32 %v3191_v49, %v581_v12  ;;  %2568 = vmatprep.mubr.msk.f32.mxu1 %vm747_vm2, %v706_v10  ;;  %v709_v14 = vmax.f32 %v587_v11, 0.0 }
  0xec   : > { %v2512_v15 = vpop.f32.mrf.mxu0  ;;  %2569 = vmatmul.mubr.msk.f32.gmra.mxu1 %vm747_vm2, %v707_v8 }
  0xed   : > { %v708_v16 = vmax.f32 %v582_v13, 0.0  ;;  %v597_v17 = vadd.f32 %v2512_v15, %v3191_v49 }
  0xee   : > { %v591_v18 = vpop.f32.mrf.mxu0 }
  0xef   : > { %v592_v19 = vadd.f32 %v3191_v49, %v591_v18  ;;  %2571 = vmatprep.mubr.msk.f32.mxu1 %vm747_vm2, %v708_v16  ;;  %v711_v20 = vmax.f32 %v597_v17, 0.0 }
  0xf0   : > { %v2515_v21 = vpop.f32.mrf.mxu0  ;;  %2572 = vmatmul.mubr.msk.f32.gmra.mxu1 %vm747_vm2, %v709_v14 }
  0xf1   : > { %v710_v22 = vmax.f32 %v592_v19, 0.0  ;;  %v607_v23 = vadd.f32 %v2515_v21, %v3191_v49  ;;  %v1472_v19 = vld [vmem:[%s3795_s7 + $0x18] sm:$0xff]  ;;  %v1469_v21 = vld [vmem:[%s3795_s7] sm:$0xff] }
  0xf2   : > { %v601_v24 = vpop.f32.mrf.mxu0  ;;  %2671 = vmatprep.subr.mxu0 %v1472_v19  ;;  %2727 = vmatprep.subr.mxu1 %v1472_v19 }
  0xf3   : > { %v602_v25 = vadd.f32 %v3191_v49, %v601_v24  ;;  %2574 = vmatprep.mubr.msk.f32.mxu1 %vm747_vm2, %v710_v22  ;;  %v713_v26 = vmax.f32 %v607_v23, 0.0  ;;  %2731 = vmatpush3.msra.mxu1 %v1472_v19  ;;  %v3272_v22 = vld [vmem:[%s3792_s4] ss:$0 sm:$0xff] }
  0xf4   : > { %v2518_v27 = vpop.f32.mrf.mxu0  ;;  %2575 = vmatmul.mubr.msk.f32.gmra.mxu1 %vm747_vm2, %v711_v20  ;;  %v1470_v20 = vld [vmem:[%s3795_s7 + $0x8] sm:$0xff] }
  0xf5   : > { %v712_v28 = vmax.f32 %v602_v25, 0.0  ;;  %v617_v29 = vadd.f32 %v2518_v27, %v3191_v49 }
  0xf6   : > { %v611_v30 = vpop.f32.mrf.mxu0 }
  0xf7   : > { %v612_v31 = vadd.f32 %v3191_v49, %v611_v30  ;;  %2577 = vmatprep.mubr.msk.f32.mxu1 %vm747_vm2, %v712_v28  ;;  %v715_v32 = vmax.f32 %v617_v29, 0.0 }
  0xf8   : > { %v2521_v33 = vpop.f32.mrf.mxu0  ;;  %2578 = vmatmul.mubr.msk.f32.gmra.mxu1 %vm747_vm2, %v713_v26 }
  0xf9   : > { %v714_v34 = vmax.f32 %v612_v31, 0.0  ;;  %v627_v35 = vadd.f32 %v2521_v33, %v3191_v49 }
  0xfa   : > { %v621_v36 = vpop.f32.mrf.mxu0 }
  0xfb   : > { %v622_v37 = vadd.f32 %v3191_v49, %v621_v36  ;;  %2580 = vmatprep.mubr.msk.f32.mxu1 %vm747_vm2, %v714_v34  ;;  %v717_v38 = vmax.f32 %v627_v35, 0.0 }
  0xfc   : > { %v2524_v39 = vpop.f32.mrf.mxu0  ;;  %2581 = vmatmul.mubr.msk.f32.gmra.mxu1 %vm747_vm2, %v715_v32 }
  0xfd   : > { %v716_v40 = vmax.f32 %v622_v37, 0.0  ;;  %v637_v41 = vadd.f32 %v2524_v39, %v3191_v49 }
  0xfe   : > { %v631_v42 = vpop.f32.mrf.mxu0 }
  0xff   : > { %v632_v43 = vadd.f32 %v3191_v49, %v631_v42  ;;  %2583 = vmatprep.mubr.msk.f32.mxu1 %vm747_vm2, %v716_v40  ;;  %v719_v44 = vmax.f32 %v637_v41, 0.0 }
 0x100   : > { %v2527_v45 = vpop.f32.mrf.mxu0  ;;  %2584 = vmatmul.mubr.msk.f32.gmra.mxu1 %vm747_vm2, %v717_v38 }
 0x101   : > { %v718_v46 = vmax.f32 %v632_v43, 0.0  ;;  %v647_v47 = vadd.f32 %v2527_v45, %v3191_v49 }
 0x102   : > { %v641_v48 = vpop.f32.mrf.mxu0 }
 0x103   : > { %v642_v50 = vadd.f32 %v3191_v49, %v641_v48  ;;  %2586 = vmatprep.mubr.msk.f32.mxu1 %vm747_vm2, %v718_v46  ;;  %v721_v51 = vmax.f32 %v647_v47, 0.0 }
 0x104   : > { %v2530_v52 = vpop.f32.mrf.mxu0  ;;  %2587 = vmatmul.mubr.msk.f32.gmra.mxu1 %vm747_vm2, %v719_v44 }
 0x105   : > { %v720_v53 = vmax.f32 %v642_v50, 0.0  ;;  %v657_v54 = vadd.f32 %v2530_v52, %v3191_v49 }
 0x106   : > { %v651_v55 = vpop.f32.mrf.mxu0 }
 0x107   : > { %v652_v56 = vadd.f32 %v3191_v49, %v651_v55  ;;  %2589 = vmatprep.mubr.msk.f32.mxu1 %vm747_vm2, %v720_v53  ;;  %v723_v57 = vmax.f32 %v657_v54, 0.0 }
 0x108   : > { %v2533_v58 = vpop.f32.mrf.mxu0  ;;  %2590 = vmatmul.mubr.msk.f32.gmra.mxu1 %vm747_vm2, %v721_v51 }
 0x109   : > { %v722_v59 = vmax.f32 %v652_v56, 0.0  ;;  %v667_v60 = vadd.f32 %v2533_v58, %v3191_v49 }
 0x10a   : > { %v661_v61 = vpop.f32.mrf.mxu0 }
 0x10b   : > { %v662_v62 = vadd.f32 %v3191_v49, %v661_v61  ;;  %2592 = vmatprep.mubr.msk.f32.mxu1 %vm747_vm2, %v722_v59  ;;  %v725_v63 = vmax.f32 %v667_v60, 0.0 }
 0x10c   : > { %v2536_v0 = vpop.f32.mrf.mxu0  ;;  %2593 = vmatmul.mubr.msk.f32.gmra.mxu1 %vm747_vm2, %v723_v57 }
 0x10d   : > { %v724_v1 = vmax.f32 %v662_v62, 0.0  ;;  %v677_v2 = vadd.f32 %v2536_v0, %v3191_v49 }
 0x10e   : > { %v671_v3 = vpop.f32.mrf.mxu0 }
 0x10f   : > { %v672_v4 = vadd.f32 %v3191_v49, %v671_v3  ;;  %2595 = vmatprep.mubr.msk.f32.mxu1 %vm747_vm2, %v724_v1  ;;  %v727_v5 = vmax.f32 %v677_v2, 0.0 }
 0x110   : > { %v2539_v6 = vpop.f32.mrf.mxu0  ;;  %2596 = vmatmul.mubr.msk.f32.gmra.mxu1 %vm747_vm2, %v725_v63 }
 0x111   : > { %v726_v7 = vmax.f32 %v672_v4, 0.0  ;;  %v687_v8 = vadd.f32 %v2539_v6, %v3191_v49 }
 0x112   : > { %v681_v9 = vpop.f32.mrf.mxu0 }
 0x113   : > { %v682_v10 = vadd.f32 %v3191_v49, %v681_v9  ;;  %2598 = vmatprep.mubr.msk.f32.mxu1 %vm747_vm2, %v726_v7  ;;  %v729_v11 = vmax.f32 %v687_v8, 0.0 }
 0x114   : > { %v2542_v12 = vpop.f32.mrf.mxu0  ;;  %2599 = vmatmul.mubr.msk.f32.gmra.mxu1 %vm747_vm2, %v727_v5 }
 0x115   : > { %v728_v13 = vmax.f32 %v682_v10, 0.0  ;;  %v697_v14 = vadd.f32 %v2542_v12, %v3191_v49 }
 0x116   : > { %v691_v15 = vpop.f32.mrf.mxu0 }
 0x117   : > { %v692_v16 = vadd.f32 %v3191_v49, %v691_v15  ;;  %2601 = vmatprep.mubr.msk.f32.mxu1 %vm747_vm2, %v728_v13  ;;  %v731_v17 = vmax.f32 %v697_v14, 0.0  ;;  %v1471_v49 = vld [vmem:[%s3795_s7 + $0x10] sm:$0xff] }
 0x118   : > { %2602 = vmatmul.mubr.msk.f32.gmra.mxu1 %vm747_vm2, %v729_v11  ;;  %2728 = vmatprep.subr.mxu1 %v1471_v49 }
 0x119   : > { %v730_v18 = vmax.f32 %v692_v16, 0.0  ;;  %2732 = vmatpush3.msra.mxu1 %v1471_v49 }
 0x11a   : > { %2729 = vmatprep.subr.mxu1 %v1470_v20 }
 0x11b   : > { %2604 = vmatprep.mubr.msk.f32.mxu1 %vm747_vm2, %v730_v18  ;;  %2733 = vmatpush3.msra.mxu1 %v1470_v20 }
 0x11c   : > { %2605 = vmatmul.mubr.msk.f32.gmra.mxu1 %vm747_vm2, %v731_v17  ;;  %2730 = vmatprep.subr.mxu1 %v1469_v21 }
 0x11d   : > { %2734 = vmatpush3.msra.mxu1 %v1469_v21 }
 0x1a0   : > { %v2561_v23 = vpop.f32.mrf.mxu1 }
 0x1a1   : > { %v916_v24 = vadd.f32 %v2561_v23, %v3272_v22 }
 0x1a2   : > { %v910_v25 = vpop.f32.mrf.mxu1 }
 0x1a3   : > { %v911_v26 = vadd.f32 %v3272_v22, %v910_v25  ;;  %v1070_v29 = vmax.f32 %v916_v24, 0.0 }
 0x1a4   : > { %v2564_v27 = vpop.f32.mrf.mxu1 }
 0x1a5   : > { %v1069_v28 = vmax.f32 %v911_v26, 0.0  ;;  %v926_v30 = vadd.f32 %v2564_v27, %v3272_v22 }
 0x1a6   : > { %v920_v31 = vpop.f32.mrf.mxu1 }
 0x1a7   : > { %v921_v32 = vadd.f32 %v3272_v22, %v920_v31  ;;  %2623 = vmatprep.mubr.msk.f32.mxu0 %vm747_vm2, %v1069_v28  ;;  %v1072_v35 = vmax.f32 %v926_v30, 0.0 }
 0x1a8   : > { %v2567_v33 = vpop.f32.mrf.mxu1  ;;  %2624 = vmatmul.mubr.msk.f32.vlgmr.msra.gmra.mxu0 %vm747_vm2, %v1070_v29 }
 0x1a9   : > { %v1071_v34 = vmax.f32 %v921_v32, 0.0  ;;  %2672 = vmatpush3.msra.mxu0 %v1472_v19  ;;  %v936_v36 = vadd.f32 %v2567_v33, %v3272_v22 }
 0x1aa   : > { %v930_v37 = vpop.f32.mrf.mxu1  ;;  %2673 = vmatprep.subr.mxu0 %v1471_v49 }
 0x1ab   : > { %v931_v38 = vadd.f32 %v3272_v22, %v930_v37  ;;  %2626 = vmatprep.mubr.msk.f32.mxu0 %vm747_vm2, %v1071_v34  ;;  %2674 = vmatpush3.msra.mxu0 %v1471_v49  ;;  %v1074_v41 = vmax.f32 %v936_v36, 0.0 }
 0x1ac   : > { %v2570_v39 = vpop.f32.mrf.mxu1  ;;  %2627 = vmatmul.mubr.msk.f32.gmra.mxu0 %vm747_vm2, %v1072_v35  ;;  %2675 = vmatprep.subr.mxu0 %v1470_v20 }
 0x1ad   : > { %v1073_v40 = vmax.f32 %v931_v38, 0.0  ;;  %2676 = vmatpush3.msra.mxu0 %v1470_v20  ;;  %v946_v42 = vadd.f32 %v2570_v39, %v3272_v22 }
 0x1ae   : > { %v940_v43 = vpop.f32.mrf.mxu1  ;;  %2677 = vmatprep.subr.mxu0 %v1469_v21 }
 0x1af   : > { %v941_v44 = vadd.f32 %v3272_v22, %v940_v43  ;;  %2629 = vmatprep.mubr.msk.f32.mxu0 %vm747_vm2, %v1073_v40  ;;  %2678 = vmatpush3.msra.mxu0 %v1469_v21  ;;  %v1076_v47 = vmax.f32 %v946_v42, 0.0 }
 0x1b0   : > { %v2573_v45 = vpop.f32.mrf.mxu1  ;;  %2630 = vmatmul.mubr.msk.f32.gmra.mxu0 %vm747_vm2, %v1074_v41 }
 0x1b1   : > { %v1075_v46 = vmax.f32 %v941_v44, 0.0  ;;  %v956_v48 = vadd.f32 %v2573_v45, %v3272_v22 }
 0x1b2   : > { %v950_v50 = vpop.f32.mrf.mxu1 }
 0x1b3   : > { %v951_v51 = vadd.f32 %v3272_v22, %v950_v50  ;;  %2632 = vmatprep.mubr.msk.f32.mxu0 %vm747_vm2, %v1075_v46  ;;  %v1078_v54 = vmax.f32 %v956_v48, 0.0 }
 0x1b4   : > { %v2576_v52 = vpop.f32.mrf.mxu1  ;;  %2633 = vmatmul.mubr.msk.f32.gmra.mxu0 %vm747_vm2, %v1076_v47 }
 0x1b5   : > { %v1077_v53 = vmax.f32 %v951_v51, 0.0  ;;  %v966_v55 = vadd.f32 %v2576_v52, %v3272_v22 }
 0x1b6   : > { %v960_v56 = vpop.f32.mrf.mxu1 }
 0x1b7   : > { %v961_v57 = vadd.f32 %v3272_v22, %v960_v56  ;;  %2635 = vmatprep.mubr.msk.f32.mxu0 %vm747_vm2, %v1077_v53  ;;  %v1080_v60 = vmax.f32 %v966_v55, 0.0 }
 0x1b8   : > { %v2579_v58 = vpop.f32.mrf.mxu1  ;;  %2636 = vmatmul.mubr.msk.f32.gmra.mxu0 %vm747_vm2, %v1078_v54 }
 0x1b9   : > { %v1079_v59 = vmax.f32 %v961_v57, 0.0  ;;  %v976_v61 = vadd.f32 %v2579_v58, %v3272_v22  ;;  %v3341_v57 = vld [vmem:[%s3794_s6] ss:$0 sm:$0xff] }
 0x1ba   : > { %v970_v62 = vpop.f32.mrf.mxu1 }
 0x1bb   : > { %v971_v63 = vadd.f32 %v3272_v22, %v970_v62  ;;  %2638 = vmatprep.mubr.msk.f32.mxu0 %vm747_vm2, %v1079_v59  ;;  %v1082_v2 = vmax.f32 %v976_v61, 0.0 }
 0x1bc   : > { %v2582_v0 = vpop.f32.mrf.mxu1  ;;  %2639 = vmatmul.mubr.msk.f32.gmra.mxu0 %vm747_vm2, %v1080_v60 }
 0x1bd   : > { %v1081_v1 = vmax.f32 %v971_v63, 0.0  ;;  %v986_v3 = vadd.f32 %v2582_v0, %v3272_v22 }
 0x1be   : > { %v980_v4 = vpop.f32.mrf.mxu1 }
 0x1bf   : > { %v981_v5 = vadd.f32 %v3272_v22, %v980_v4  ;;  %2641 = vmatprep.mubr.msk.f32.mxu0 %vm747_vm2, %v1081_v1  ;;  %v1084_v8 = vmax.f32 %v986_v3, 0.0 }
 0x1c0   : > { %v2585_v6 = vpop.f32.mrf.mxu1  ;;  %2642 = vmatmul.mubr.msk.f32.gmra.mxu0 %vm747_vm2, %v1082_v2 }
 0x1c1   : > { %v1083_v7 = vmax.f32 %v981_v5, 0.0  ;;  %v996_v9 = vadd.f32 %v2585_v6, %v3272_v22 }
 0x1c2   : > { %v990_v10 = vpop.f32.mrf.mxu1 }
 0x1c3   : > { %v991_v11 = vadd.f32 %v3272_v22, %v990_v10  ;;  %2644 = vmatprep.mubr.msk.f32.mxu0 %vm747_vm2, %v1083_v7  ;;  %v1086_v14 = vmax.f32 %v996_v9, 0.0 }
 0x1c4   : > { %v2588_v12 = vpop.f32.mrf.mxu1  ;;  %2645 = vmatmul.mubr.msk.f32.gmra.mxu0 %vm747_vm2, %v1084_v8 }
 0x1c5   : > { %v1085_v13 = vmax.f32 %v991_v11, 0.0  ;;  %v1006_v15 = vadd.f32 %v2588_v12, %v3272_v22 }
 0x1c6   : > { %v1000_v16 = vpop.f32.mrf.mxu1 }
 0x1c7   : > { %v1001_v17 = vadd.f32 %v3272_v22, %v1000_v16  ;;  %2647 = vmatprep.mubr.msk.f32.mxu0 %vm747_vm2, %v1085_v13  ;;  %v1088_v49 = vmax.f32 %v1006_v15, 0.0 }
 0x1c8   : > { %v2591_v18 = vpop.f32.mrf.mxu1  ;;  %2648 = vmatmul.mubr.msk.f32.gmra.mxu0 %vm747_vm2, %v1086_v14 }
 0x1c9   : > { %v1087_v19 = vmax.f32 %v1001_v17, 0.0  ;;  %v1016_v20 = vadd.f32 %v2591_v18, %v3272_v22 }
 0x1ca   : > { %v1010_v21 = vpop.f32.mrf.mxu1 }
 0x1cb   : > { %v1011_v23 = vadd.f32 %v3272_v22, %v1010_v21  ;;  %2650 = vmatprep.mubr.msk.f32.mxu0 %vm747_vm2, %v1087_v19  ;;  %v1090_v26 = vmax.f32 %v1016_v20, 0.0 }
 0x1cc   : > { %v2594_v24 = vpop.f32.mrf.mxu1  ;;  %2651 = vmatmul.mubr.msk.f32.gmra.mxu0 %vm747_vm2, %v1088_v49 }
 0x1cd   : > { %v1089_v25 = vmax.f32 %v1011_v23, 0.0  ;;  %v1026_v27 = vadd.f32 %v2594_v24, %v3272_v22 }
 0x1ce   : > { %v1020_v28 = vpop.f32.mrf.mxu1 }
 0x1cf   : > { %v1021_v29 = vadd.f32 %v3272_v22, %v1020_v28  ;;  %2653 = vmatprep.mubr.msk.f32.mxu0 %vm747_vm2, %v1089_v25  ;;  %v1092_v32 = vmax.f32 %v1026_v27, 0.0 }
 0x1d0   : > { %v2597_v30 = vpop.f32.mrf.mxu1  ;;  %2654 = vmatmul.mubr.msk.f32.gmra.mxu0 %vm747_vm2, %v1090_v26 }
 0x1d1   : > { %v1091_v31 = vmax.f32 %v1021_v29, 0.0  ;;  %v1036_v33 = vadd.f32 %v2597_v30, %v3272_v22 }
 0x1d2   : > { %v1030_v34 = vpop.f32.mrf.mxu1 }
 0x1d3   : > { %v1031_v35 = vadd.f32 %v3272_v22, %v1030_v34  ;;  %2656 = vmatprep.mubr.msk.f32.mxu0 %vm747_vm2, %v1091_v31  ;;  %v1094_v38 = vmax.f32 %v1036_v33, 0.0 }
 0x1d4   : > { %v2600_v36 = vpop.f32.mrf.mxu1  ;;  %2657 = vmatmul.mubr.msk.f32.gmra.mxu0 %vm747_vm2, %v1092_v32 }
 0x1d5   : > { %v1093_v37 = vmax.f32 %v1031_v35, 0.0  ;;  %v1046_v39 = vadd.f32 %v2600_v36, %v3272_v22 }
 0x1d6   : > { %v1040_v40 = vpop.f32.mrf.mxu1 }
 0x1d7   : > { %v1041_v41 = vadd.f32 %v3272_v22, %v1040_v40  ;;  %2659 = vmatprep.mubr.msk.f32.mxu0 %vm747_vm2, %v1093_v37  ;;  %v1096_v44 = vmax.f32 %v1046_v39, 0.0 }
 0x1d8   : > { %v2603_v42 = vpop.f32.mrf.mxu1  ;;  %2660 = vmatmul.mubr.msk.f32.gmra.mxu0 %vm747_vm2, %v1094_v38 }
 0x1d9   : > { %v1095_v43 = vmax.f32 %v1041_v41, 0.0  ;;  %v1056_v45 = vadd.f32 %v2603_v42, %v3272_v22 }
 0x1da   : > { %v1050_v46 = vpop.f32.mrf.mxu1 }
 0x1db   : > { %v1051_v47 = vadd.f32 %v3272_v22, %v1050_v46  ;;  %2662 = vmatprep.mubr.msk.f32.mxu0 %vm747_vm2, %v1095_v43  ;;  %v1098_v51 = vmax.f32 %v1056_v45, 0.0 }
 0x1dc   : > { %v2606_v48 = vpop.f32.mrf.mxu1  ;;  %2663 = vmatmul.mubr.msk.f32.gmra.mxu0 %vm747_vm2, %v1096_v44 }
 0x1dd   : > { %v1097_v50 = vmax.f32 %v1051_v47, 0.0  ;;  %v1066_v52 = vadd.f32 %v2606_v48, %v3272_v22 }
 0x1de   : > { %v1060_v53 = vpop.f32.mrf.mxu1 }
 0x1df   : > { %v1061_v54 = vadd.f32 %v3272_v22, %v1060_v53  ;;  %2665 = vmatprep.mubr.msk.f32.mxu0 %vm747_vm2, %v1097_v50  ;;  %v1100_v56 = vmax.f32 %v1066_v52, 0.0 }
 0x1e0   : > { %2666 = vmatmul.mubr.msk.f32.gmra.mxu0 %vm747_vm2, %v1098_v51 }
 0x1e1   : > { %v1099_v55 = vmax.f32 %v1061_v54, 0.0 }
 0x1e3   : > { %2668 = vmatprep.mubr.msk.f32.mxu0 %vm747_vm2, %v1099_v55 }
 0x1e4   : > { %2669 = vmatmul.mubr.msk.f32.gmra.mxu0 %vm747_vm2, %v1100_v56 }
 0x268   : > { %v2625_v58 = vpop.f32.mrf.mxu0 }
 0x269   : > { %v1284_v59 = vadd.f32 %v2625_v58, %v3341_v57 }
 0x26a   : > { %v1278_v60 = vpop.f32.mrf.mxu0 }
 0x26b   : > { %v1279_v22 = vadd.f32 %v3341_v57, %v1278_v60  ;;  %v1438_v63 = vmax.f32 %v1284_v59, 0.0 }
 0x26c   : > { %v2628_v61 = vpop.f32.mrf.mxu0 }
 0x26d   : > { %v1437_v62 = vmax.f32 %v1279_v22, 0.0  ;;  %v1294_v0 = vadd.f32 %v2628_v61, %v3341_v57 }
 0x26e   : > { %v1288_v1 = vpop.f32.mrf.mxu0 }
 0x26f   : > { %v1289_v2 = vadd.f32 %v3341_v57, %v1288_v1  ;;  %2679 = vmatprep.mubr.msk.f32.mxu0 %vm1480_vm3, %v1437_v62  ;;  %v1440_v5 = vmax.f32 %v1294_v0, 0.0 }
 0x270   : > { %v2631_v3 = vpop.f32.mrf.mxu0  ;;  %2680 = vmatmul.mubr.msk.f32.vlgmr.msra.gmra.mxu0 %vm1480_vm3, %v1438_v63 }
 0x271   : > { %v1439_v4 = vmax.f32 %v1289_v2, 0.0  ;;  %v1304_v6 = vadd.f32 %v2631_v3, %v3341_v57 }
 0x272   : > { %v1298_v7 = vpop.f32.mrf.mxu0 }
 0x273   : > { %v1299_v8 = vadd.f32 %v3341_v57, %v1298_v7  ;;  %2682 = vmatprep.mubr.msk.f32.mxu1 %vm1480_vm3, %v1439_v4  ;;  %v1442_v11 = vmax.f32 %v1304_v6, 0.0 }
 0x274   : > { %v2634_v9 = vpop.f32.mrf.mxu0  ;;  %2683 = vmatmul.mubr.msk.f32.vlgmr.msra.gmra.mxu1 %vm1480_vm3, %v1440_v5 }
 0x275   : > { %v1441_v10 = vmax.f32 %v1299_v8, 0.0  ;;  %v1314_v12 = vadd.f32 %v2634_v9, %v3341_v57 }
 0x276   : > { %v1308_v13 = vpop.f32.mrf.mxu0 }
 0x277   : > { %v1309_v14 = vadd.f32 %v3341_v57, %v1308_v13  ;;  %2685 = vmatprep.mubr.msk.f32.mxu1 %vm1480_vm3, %v1441_v10  ;;  %v1444_v17 = vmax.f32 %v1314_v12, 0.0 }
 0x278   : > { %v2637_v15 = vpop.f32.mrf.mxu0  ;;  %2686 = vmatmul.mubr.msk.f32.gmra.mxu1 %vm1480_vm3, %v1442_v11 }
 0x279   : > { %v1443_v16 = vmax.f32 %v1309_v14, 0.0  ;;  %v1324_v18 = vadd.f32 %v2637_v15, %v3341_v57 }
 0x27a   : > { %v1318_v19 = vpop.f32.mrf.mxu0 }
 0x27b   : > { %v1319_v49 = vadd.f32 %v3341_v57, %v1318_v19  ;;  %2688 = vmatprep.mubr.msk.f32.mxu1 %vm1480_vm3, %v1443_v16  ;;  %v1446_v23 = vmax.f32 %v1324_v18, 0.0 }
 0x27c   : > { %v2640_v20 = vpop.f32.mrf.mxu0  ;;  %2689 = vmatmul.mubr.msk.f32.gmra.mxu1 %vm1480_vm3, %v1444_v17 }
 0x27d   : > { %v1445_v21 = vmax.f32 %v1319_v49, 0.0  ;;  %v1334_v24 = vadd.f32 %v2640_v20, %v3341_v57 }
 0x27e   : > { %v1328_v25 = vpop.f32.mrf.mxu0 }
 0x27f   : > { %v1329_v26 = vadd.f32 %v3341_v57, %v1328_v25  ;;  %2691 = vmatprep.mubr.msk.f32.mxu1 %vm1480_vm3, %v1445_v21  ;;  %v1448_v29 = vmax.f32 %v1334_v24, 0.0 }
 0x280   : > { %v2643_v27 = vpop.f32.mrf.mxu0  ;;  %2692 = vmatmul.mubr.msk.f32.gmra.mxu1 %vm1480_vm3, %v1446_v23 }
 0x281   : > { %v1447_v28 = vmax.f32 %v1329_v26, 0.0  ;;  %v1344_v30 = vadd.f32 %v2643_v27, %v3341_v57  ;;  %v3410_v26 = vld [vmem:[%s3796_s8] ss:$0 sm:$0xff] }
 0x282   : > { %v1338_v31 = vpop.f32.mrf.mxu0 }
 0x283   : > { %v1339_v32 = vadd.f32 %v3341_v57, %v1338_v31  ;;  %2694 = vmatprep.mubr.msk.f32.mxu1 %vm1480_vm3, %v1447_v28  ;;  %v1450_v35 = vmax.f32 %v1344_v30, 0.0 }
 0x284   : > { %v2646_v33 = vpop.f32.mrf.mxu0  ;;  %2695 = vmatmul.mubr.msk.f32.gmra.mxu1 %vm1480_vm3, %v1448_v29 }
 0x285   : > { %v1449_v34 = vmax.f32 %v1339_v32, 0.0  ;;  %v1354_v36 = vadd.f32 %v2646_v33, %v3341_v57 }
 0x286   : > { %v1348_v37 = vpop.f32.mrf.mxu0 }
 0x287   : > { %v1349_v38 = vadd.f32 %v3341_v57, %v1348_v37  ;;  %2697 = vmatprep.mubr.msk.f32.mxu1 %vm1480_vm3, %v1449_v34  ;;  %v1452_v41 = vmax.f32 %v1354_v36, 0.0 }
 0x288   : > { %v2649_v39 = vpop.f32.mrf.mxu0  ;;  %2698 = vmatmul.mubr.msk.f32.gmra.mxu1 %vm1480_vm3, %v1450_v35 }
 0x289   : > { %v1451_v40 = vmax.f32 %v1349_v38, 0.0  ;;  %v1364_v42 = vadd.f32 %v2649_v39, %v3341_v57 }
 0x28a   : > { %v1358_v43 = vpop.f32.mrf.mxu0 }
 0x28b   : > { %v1359_v44 = vadd.f32 %v3341_v57, %v1358_v43  ;;  %2700 = vmatprep.mubr.msk.f32.mxu1 %vm1480_vm3, %v1451_v40  ;;  %v1454_v47 = vmax.f32 %v1364_v42, 0.0 }
 0x28c   : > { %v2652_v45 = vpop.f32.mrf.mxu0  ;;  %2701 = vmatmul.mubr.msk.f32.gmra.mxu1 %vm1480_vm3, %v1452_v41 }
 0x28d   : > { %v1453_v46 = vmax.f32 %v1359_v44, 0.0  ;;  %v1374_v48 = vadd.f32 %v2652_v45, %v3341_v57 }
 0x28e   : > { %v1368_v50 = vpop.f32.mrf.mxu0 }
 0x28f   : > { %v1369_v51 = vadd.f32 %v3341_v57, %v1368_v50  ;;  %2703 = vmatprep.mubr.msk.f32.mxu1 %vm1480_vm3, %v1453_v46  ;;  %v1456_v54 = vmax.f32 %v1374_v48, 0.0 }
 0x290   : > { %v2655_v52 = vpop.f32.mrf.mxu0  ;;  %2704 = vmatmul.mubr.msk.f32.gmra.mxu1 %vm1480_vm3, %v1454_v47 }
 0x291   : > { %v1455_v53 = vmax.f32 %v1369_v51, 0.0  ;;  %v1384_v55 = vadd.f32 %v2655_v52, %v3341_v57 }
 0x292   : > { %v1378_v56 = vpop.f32.mrf.mxu0 }
 0x293   : > { %v1379_v58 = vadd.f32 %v3341_v57, %v1378_v56  ;;  %2706 = vmatprep.mubr.msk.f32.mxu1 %vm1480_vm3, %v1455_v53  ;;  %v1458_v22 = vmax.f32 %v1384_v55, 0.0 }
 0x294   : > { %v2658_v59 = vpop.f32.mrf.mxu0  ;;  %2707 = vmatmul.mubr.msk.f32.gmra.mxu1 %vm1480_vm3, %v1456_v54 }
 0x295   : > { %v1457_v60 = vmax.f32 %v1379_v58, 0.0  ;;  %v1394_v61 = vadd.f32 %v2658_v59, %v3341_v57 }
 0x296   : > { %v1388_v62 = vpop.f32.mrf.mxu0 }
 0x297   : > { %v1389_v63 = vadd.f32 %v3341_v57, %v1388_v62  ;;  %2709 = vmatprep.mubr.msk.f32.mxu1 %vm1480_vm3, %v1457_v60  ;;  %v1460_v2 = vmax.f32 %v1394_v61, 0.0 }
 0x298   : > { %v2661_v0 = vpop.f32.mrf.mxu0  ;;  %2710 = vmatmul.mubr.msk.f32.gmra.mxu1 %vm1480_vm3, %v1458_v22 }
 0x299   : > { %v1459_v1 = vmax.f32 %v1389_v63, 0.0  ;;  %v1404_v3 = vadd.f32 %v2661_v0, %v3341_v57 }
 0x29a   : > { %v1398_v4 = vpop.f32.mrf.mxu0 }
 0x29b   : > { %v1399_v5 = vadd.f32 %v3341_v57, %v1398_v4  ;;  %2712 = vmatprep.mubr.msk.f32.mxu1 %vm1480_vm3, %v1459_v1  ;;  %v1462_v8 = vmax.f32 %v1404_v3, 0.0 }
 0x29c   : > { %v2664_v6 = vpop.f32.mrf.mxu0  ;;  %2713 = vmatmul.mubr.msk.f32.gmra.mxu1 %vm1480_vm3, %v1460_v2 }
 0x29d   : > { %v1461_v7 = vmax.f32 %v1399_v5, 0.0  ;;  %v1414_v9 = vadd.f32 %v2664_v6, %v3341_v57 }
 0x29e   : > { %v1408_v10 = vpop.f32.mrf.mxu0 }
 0x29f   : > { %v1409_v11 = vadd.f32 %v3341_v57, %v1408_v10  ;;  %2715 = vmatprep.mubr.msk.f32.mxu1 %vm1480_vm3, %v1461_v7  ;;  %v1464_v14 = vmax.f32 %v1414_v9, 0.0 }
 0x2a0   : > { %v2667_v12 = vpop.f32.mrf.mxu0  ;;  %2716 = vmatmul.mubr.msk.f32.gmra.mxu1 %vm1480_vm3, %v1462_v8 }
 0x2a1   : > { %v1463_v13 = vmax.f32 %v1409_v11, 0.0  ;;  %v1424_v15 = vadd.f32 %v2667_v12, %v3341_v57 }
 0x2a2   : > { %v1418_v16 = vpop.f32.mrf.mxu0 }
 0x2a3   : > { %v1419_v17 = vadd.f32 %v3341_v57, %v1418_v16  ;;  %2718 = vmatprep.mubr.msk.f32.mxu1 %vm1480_vm3, %v1463_v13  ;;  %v1466_v49 = vmax.f32 %v1424_v15, 0.0 }
 0x2a4   : > { %v2670_v18 = vpop.f32.mrf.mxu0  ;;  %2719 = vmatmul.mubr.msk.f32.gmra.mxu1 %vm1480_vm3, %v1464_v14 }
 0x2a5   : > { %v1465_v19 = vmax.f32 %v1419_v17, 0.0  ;;  %v1434_v20 = vadd.f32 %v2670_v18, %v3341_v57 }
 0x2a6   : > { %v1428_v21 = vpop.f32.mrf.mxu0 }
 0x2a7   : > { %v1429_v23 = vadd.f32 %v3341_v57, %v1428_v21  ;;  %2721 = vmatprep.mubr.msk.f32.mxu1 %vm1480_vm3, %v1465_v19  ;;  %v1468_v25 = vmax.f32 %v1434_v20, 0.0 }
 0x2a8   : > { %2722 = vmatmul.mubr.msk.f32.gmra.mxu1 %vm1480_vm3, %v1466_v49 }
 0x2a9   : > { %v1467_v24 = vmax.f32 %v1429_v23, 0.0 }
 0x2ab   : > { %2724 = vmatprep.mubr.msk.f32.mxu1 %vm1480_vm3, %v1467_v24 }
 0x2ac   : > { %2725 = vmatmul.mubr.msk.f32.gmra.mxu1 %vm1480_vm3, %v1468_v25 }
 0x330   : > { %v2681_v27 = vpop.f32.mrf.mxu0 }
 0x331   : > { %v3413_v28 = vadd.f32 %v2681_v27, %v3410_v26 }
 0x332   : > { %v1643_v57 = vpop.f32.mrf.mxu0 }
 0x333   : > { %1804 = vmax.xlane.f32.xlu0 %v3413_v28  ;;  %v3417_v30 = vadd.f32 %v3410_v26, %v1643_v57 }
 0x334   : > { %v2684_v29 = vpop.f32.mrf.mxu1 }
 0x335   : > { %v3420_v31 = vadd.f32 %v2684_v29, %v3410_v26 }
 0x336   : > { %v1653_v32 = vpop.f32.mrf.mxu1 }
 0x337   : > { %1808 = vmax.xlane.f32.xlu1 %v3420_v31  ;;  %1802 = vmax.xlane.f32.xlu0 %v3417_v30  ;;  %v3425_v34 = vadd.f32 %v3410_v26, %v1653_v32 }
 0x338   : > { %v2687_v33 = vpop.f32.mrf.mxu1 }
 0x339   : > { %v3432_v38 = vadd.f32 %v2687_v33, %v3410_v26 }
 0x33a   : > { %v1663_v35 = vpop.f32.mrf.mxu1 }
 0x33b   : > { %v3428_v36 = vadd.f32 %v3410_v26, %v1663_v35  ;;  %1806 = vmax.xlane.f32.xlu1 %v3425_v34 }
 0x33c   : > { %v2690_v37 = vpop.f32.mrf.mxu1 }
 0x33d   : > { %1810 = vmax.xlane.f32.xlu0 %v3428_v36  ;;  %v3440_v42 = vadd.f32 %v2690_v37, %v3410_v26 }
 0x33e   : > { %v1673_v39 = vpop.f32.mrf.mxu1 }
 0x33f   : > { %v3436_v40 = vadd.f32 %v3410_v26, %v1673_v39  ;;  %1812 = vmax.xlane.f32.xlu1 %v3432_v38 }
 0x340   : > { %v2693_v41 = vpop.f32.mrf.mxu1 }
 0x341   : > { %1814 = vmax.xlane.f32.xlu0 %v3436_v40  ;;  %v3448_v46 = vadd.f32 %v2693_v41, %v3410_v26 }
 0x342   : > { %v1683_v43 = vpop.f32.mrf.mxu1 }
 0x343   : > { %v3444_v44 = vadd.f32 %v3410_v26, %v1683_v43  ;;  %1816 = vmax.xlane.f32.xlu1 %v3440_v42 }
 0x344   : > { %v2696_v45 = vpop.f32.mrf.mxu1 }
 0x345   : > { %1818 = vmax.xlane.f32.xlu0 %v3444_v44  ;;  %v3456_v51 = vadd.f32 %v2696_v45, %v3410_v26 }
 0x346   : > { %v1693_v47 = vpop.f32.mrf.mxu1 }
 0x347   : > { %v3452_v48 = vadd.f32 %v3410_v26, %v1693_v47  ;;  %1820 = vmax.xlane.f32.xlu1 %v3448_v46 }
 0x348   : > { %v2699_v50 = vpop.f32.mrf.mxu1 }
 0x349   : > { %1822 = vmax.xlane.f32.xlu0 %v3452_v48  ;;  %v3464_v55 = vadd.f32 %v2699_v50, %v3410_v26 }
 0x34a   : > { %v1703_v52 = vpop.f32.mrf.mxu1 }
 0x34b   : > { %v3460_v53 = vadd.f32 %v3410_v26, %v1703_v52  ;;  %1824 = vmax.xlane.f32.xlu1 %v3456_v51 }
 0x34c   : > { %v2702_v54 = vpop.f32.mrf.mxu1 }
 0x34d   : > { %1826 = vmax.xlane.f32.xlu0 %v3460_v53  ;;  %v3472_v60 = vadd.f32 %v2702_v54, %v3410_v26 }
 0x34e   : > { %v1713_v56 = vpop.f32.mrf.mxu1 }
 0x34f   : > { %v3468_v58 = vadd.f32 %v3410_v26, %v1713_v56  ;;  %1828 = vmax.xlane.f32.xlu1 %v3464_v55 }
 0x350   : > { %v2705_v59 = vpop.f32.mrf.mxu1 }
 0x351   : > { %1830 = vmax.xlane.f32.xlu0 %v3468_v58  ;;  %v3480_v63 = vadd.f32 %v2705_v59, %v3410_v26 }
 0x352   : > { %v1723_v22 = vpop.f32.mrf.mxu1 }
 0x353   : > { %v3476_v61 = vadd.f32 %v3410_v26, %v1723_v22  ;;  %1832 = vmax.xlane.f32.xlu1 %v3472_v60 }
 0x354   : > { %v2708_v62 = vpop.f32.mrf.mxu1 }
 0x355   : > { %1834 = vmax.xlane.f32.xlu0 %v3476_v61  ;;  %v3488_v3 = vadd.f32 %v2708_v62, %v3410_v26 }
 0x356   : > { %v1733_v0 = vpop.f32.mrf.mxu1 }
 0x357   : > { %v3484_v1 = vadd.f32 %v3410_v26, %v1733_v0  ;;  %1836 = vmax.xlane.f32.xlu1 %v3480_v63 }
 0x358   : > { %v2711_v2 = vpop.f32.mrf.mxu1 }
 0x359   : > { %1838 = vmax.xlane.f32.xlu0 %v3484_v1  ;;  %v3496_v7 = vadd.f32 %v2711_v2, %v3410_v26 }
 0x35a   : > { %v1743_v4 = vpop.f32.mrf.mxu1 }
 0x35b   : > { %v3492_v5 = vadd.f32 %v3410_v26, %v1743_v4  ;;  %1840 = vmax.xlane.f32.xlu1 %v3488_v3 }
 0x35c   : > { %v2714_v6 = vpop.f32.mrf.mxu1 }
 0x35d   : > { %1842 = vmax.xlane.f32.xlu0 %v3492_v5  ;;  %v3504_v11 = vadd.f32 %v2714_v6, %v3410_v26 }
 0x35e   : > { %v1753_v8 = vpop.f32.mrf.mxu1 }
 0x35f   : > { %v3500_v9 = vadd.f32 %v3410_v26, %v1753_v8  ;;  %1844 = vmax.xlane.f32.xlu1 %v3496_v7 }
 0x360   : > { %v2717_v10 = vpop.f32.mrf.mxu1 }
 0x361   : > { %1846 = vmax.xlane.f32.xlu0 %v3500_v9  ;;  %v3512_v15 = vadd.f32 %v2717_v10, %v3410_v26 }
 0x362   : > { %v1763_v12 = vpop.f32.mrf.mxu1 }
 0x363   : > { %v3508_v13 = vadd.f32 %v3410_v26, %v1763_v12  ;;  %1848 = vmax.xlane.f32.xlu1 %v3504_v11 }
 0x364   : > { %v2720_v14 = vpop.f32.mrf.mxu1 }
 0x365   : > { %1850 = vmax.xlane.f32.xlu0 %v3508_v13  ;;  %v3520_v19 = vadd.f32 %v2720_v14, %v3410_v26 }
 0x366   : > { %v1773_v16 = vpop.f32.mrf.mxu1 }
 0x367   : > { %v3516_v17 = vadd.f32 %v3410_v26, %v1773_v16  ;;  %1852 = vmax.xlane.f32.xlu1 %v3512_v15 }
 0x368   : > { %v2723_v18 = vpop.f32.mrf.mxu1 }
 0x369   : > { %1854 = vmax.xlane.f32.xlu0 %v3516_v17  ;;  %v3528_v23 = vadd.f32 %v2723_v18, %v3410_v26 }
 0x36a   : > { %v1783_v49 = vpop.f32.mrf.mxu1 }
 0x36b   : > { %v3524_v20 = vadd.f32 %v3410_v26, %v1783_v49  ;;  %1856 = vmax.xlane.f32.xlu1 %v3520_v19 }
 0x36c   : > { %v2726_v21 = vpop.f32.mrf.mxu1 }
 0x36d   : > { %1858 = vmax.xlane.f32.xlu0 %v3524_v20  ;;  %v3536_v27 = vadd.f32 %v2726_v21, %v3410_v26 }
 0x36e   : > { %v1793_v24 = vpop.f32.mrf.mxu1 }
 0x36f   : > { %v3532_v25 = vadd.f32 %v3410_v26, %v1793_v24  ;;  %1860 = vmax.xlane.f32.xlu1 %v3528_v23 }
 0x371   : > { %1862 = vmax.xlane.f32.xlu0 %v3532_v25 }
 0x373   : > { %1864 = vmax.xlane.f32.xlu1 %v3536_v27 }
 0x3bc   : > { %v1805_v57 = vpop.xlane.xlu0 %1804 }
 0x3bd   : > { %v1867_v29 = vsub.f32 %v3413_v28, %v1805_v57 }
 0x3bf   : > { %v1900_v32 = vmul.f32 1.442695, %v1867_v29 }
 0x3c0   : > { %v1809_v33 = vpop.xlane.xlu1 %1808  ;;  %v1803_v35 = vpop.xlane.xlu0 %1802 }
 0x3c1   : > { %2776 = vpow2.f32 %v1900_v32  ;;  %v1869_v37 = vsub.f32 %v3420_v31, %v1809_v33  ;;  %v1866_v39 = vsub.f32 %v3417_v30, %v1803_v35 }
 0x3c3   : > { %v1904_v41 = vmul.f32 1.442695, %v1869_v37  ;;  %v1898_v43 = vmul.f32 1.442695, %v1866_v39 }
 0x3c4   : > { %v1807_v45 = vpop.xlane.xlu1 %1806 }
 0x3c5   : > { %2778 = vpow2.f32 %v1904_v41  ;;  %v1868_v26 = vsub.f32 %v3425_v34, %v1807_v45 }
 0x3c6   : > { %2780 = vpow2.f32 %v1898_v43  ;;  %v1811_v47 = vpop.xlane.xlu0 %1810 }
 0x3c7   : > { %v1902_v50 = vmul.f32 1.442695, %v1868_v26  ;;  %v1870_v52 = vsub.f32 %v3428_v36, %v1811_v47 }
 0x3c8   : > { %v1813_v28 = vpop.xlane.xlu1 %1812 }
 0x3c9   : > { %2782 = vpow2.f32 %v1902_v50  ;;  %v1871_v54 = vsub.f32 %v3432_v38, %v1813_v28  ;;  %v1906_v56 = vmul.f32 1.442695, %v1870_v52 }
 0x3ca   : > { %v1815_v59 = vpop.xlane.xlu0 %1814 }
 0x3cb   : > { %v1908_v31 = vmul.f32 1.442695, %v1871_v54  ;;  %v1872_v30 = vsub.f32 %v3436_v40, %v1815_v59 }
 0x3cc   : > { %v1817_v22 = vpop.xlane.xlu1 %1816 }
 0x3cd   : > { %2784 = vpow2.f32 %v1908_v31  ;;  %v1873_v62 = vsub.f32 %v3440_v42, %v1817_v22  ;;  %v1910_v34 = vmul.f32 1.442695, %v1872_v30 }
 0x3ce   : > { %v3548_v0 = vpop.eup %2776  ;;  %2786 = vpow2.f32 %v1906_v56  ;;  %v1819_v2 = vpop.xlane.xlu0 %1818 }
 0x3cf   : > { %v1912_v4 = vmul.f32 1.442695, %v1873_v62  ;;  %v1874_v36 = vsub.f32 %v3444_v44, %v1819_v2  ;;  %1964 = vadd.xlane.f32.xlu1 %v3548_v0 }
 0x3d0   : > { %v1821_v38 = vpop.xlane.xlu1 %1820 }
 0x3d1   : > { %2788 = vpow2.f32 %v1912_v4  ;;  %v1875_v6 = vsub.f32 %v3448_v46, %v1821_v38  ;;  %v1914_v40 = vmul.f32 1.442695, %v1874_v36 }
 0x3d2   : > { %v3553_v8 = vpop.eup %2778  ;;  %2790 = vpow2.f32 %v1910_v34  ;;  %v1823_v10 = vpop.xlane.xlu0 %1822 }
 0x3d3   : > { %v3555_v42 = vpop.eup %2780  ;;  %v1916_v12 = vmul.f32 1.442695, %v1875_v6  ;;  %v1876_v14 = vsub.f32 %v3452_v48, %v1823_v10  ;;  %1968 = vadd.xlane.f32.xlu1 %v3553_v8 }
 0x3d4   : > { %1962 = vadd.xlane.f32.xlu0 %v3555_v42  ;;  %v1825_v44 = vpop.xlane.xlu1 %1824 }
 0x3d5   : > { %2792 = vpow2.f32 %v1916_v12  ;;  %v1877_v16 = vsub.f32 %v3456_v51, %v1825_v44  ;;  %v1918_v46 = vmul.f32 1.442695, %v1876_v14 }
 0x3d6   : > { %v3561_v18 = vpop.eup %2782  ;;  %2794 = vpow2.f32 %v1914_v40  ;;  %v1827_v49 = vpop.xlane.xlu0 %1826 }
 0x3d7   : > { %v1920_v21 = vmul.f32 1.442695, %v1877_v16  ;;  %v1878_v24 = vsub.f32 %v3460_v53, %v1827_v49 }
 0x3d8   : > { %1966 = vadd.xlane.f32.xlu0 %v3561_v18  ;;  %v1829_v57 = vpop.xlane.xlu1 %1828 }
 0x3d9   : > { %2796 = vpow2.f32 %v1920_v21  ;;  %v1879_v48 = vsub.f32 %v3464_v55, %v1829_v57  ;;  %v1922_v32 = vmul.f32 1.442695, %v1878_v24 }
 0x3da   : > { %v3566_v29 = vpop.eup %2784  ;;  %2798 = vpow2.f32 %v1918_v46  ;;  %v1831_v33 = vpop.xlane.xlu0 %1830 }
 0x3db   : > { %v3568_v51 = vpop.eup %2786  ;;  %v1924_v35 = vmul.f32 1.442695, %v1879_v48  ;;  %v1880_v37 = vsub.f32 %v3468_v58, %v1831_v33  ;;  %1972 = vadd.xlane.f32.xlu1 %v3566_v29 }
 0x3dc   : > { %1970 = vadd.xlane.f32.xlu0 %v3568_v51  ;;  %v1833_v53 = vpop.xlane.xlu1 %1832 }
 0x3dd   : > { %2800 = vpow2.f32 %v1924_v35  ;;  %v1881_v39 = vsub.f32 %v3472_v60, %v1833_v53  ;;  %v1926_v55 = vmul.f32 1.442695, %v1880_v37 }
 0x3de   : > { %v3574_v41 = vpop.eup %2788  ;;  %2802 = vpow2.f32 %v1922_v32  ;;  %v1835_v43 = vpop.xlane.xlu0 %1834 }
 0x3df   : > { %v3576_v45 = vpop.eup %2790  ;;  %v1928_v26 = vmul.f32 1.442695, %v1881_v39  ;;  %v1882_v47 = vsub.f32 %v3476_v61, %v1835_v43  ;;  %1976 = vadd.xlane.f32.xlu1 %v3574_v41 }
 0x3e0   : > { %1974 = vadd.xlane.f32.xlu0 %v3576_v45  ;;  %v1837_v58 = vpop.xlane.xlu1 %1836 }
 0x3e1   : > { %2804 = vpow2.f32 %v1928_v26  ;;  %v1883_v50 = vsub.f32 %v3480_v63, %v1837_v58  ;;  %v1930_v60 = vmul.f32 1.442695, %v1882_v47 }
 0x3e2   : > { %v3582_v52 = vpop.eup %2792  ;;  %2806 = vpow2.f32 %v1926_v55  ;;  %v1839_v28 = vpop.xlane.xlu0 %1838 }
 0x3e3   : > { %v3584_v54 = vpop.eup %2794  ;;  %v1932_v56 = vmul.f32 1.442695, %v1883_v50  ;;  %v1884_v59 = vsub.f32 %v3484_v1, %v1839_v28  ;;  %1980 = vadd.xlane.f32.xlu1 %v3582_v52 }
 0x3e4   : > { %1978 = vadd.xlane.f32.xlu0 %v3584_v54  ;;  %v1841_v61 = vpop.xlane.xlu1 %1840 }
 0x3e5   : > { %2808 = vpow2.f32 %v1932_v56  ;;  %v1885_v31 = vsub.f32 %v3488_v3, %v1841_v61  ;;  %v1934_v63 = vmul.f32 1.442695, %v1884_v59 }
 0x3e6   : > { %v3590_v30 = vpop.eup %2796  ;;  %2810 = vpow2.f32 %v1930_v60  ;;  %v1843_v22 = vpop.xlane.xlu0 %1842 }
 0x3e7   : > { %v3592_v62 = vpop.eup %2798  ;;  %v1936_v34 = vmul.f32 1.442695, %v1885_v31  ;;  %v1886_v2 = vsub.f32 %v3492_v5, %v1843_v22  ;;  %1984 = vadd.xlane.f32.xlu1 %v3590_v30 }
 0x3e8   : > { %1982 = vadd.xlane.f32.xlu0 %v3592_v62  ;;  %v1845_v1 = vpop.xlane.xlu1 %1844 }
 0x3e9   : > { %2812 = vpow2.f32 %v1936_v34  ;;  %v1887_v4 = vsub.f32 %v3496_v7, %v1845_v1  ;;  %v1938_v3 = vmul.f32 1.442695, %v1886_v2 }
 0x3ea   : > { %v3598_v36 = vpop.eup %2800  ;;  %2814 = vpow2.f32 %v1934_v63  ;;  %v1847_v38 = vpop.xlane.xlu0 %1846 }
 0x3eb   : > { %v3600_v6 = vpop.eup %2802  ;;  %v1940_v40 = vmul.f32 1.442695, %v1887_v4  ;;  %v1888_v10 = vsub.f32 %v3500_v9, %v1847_v38  ;;  %1988 = vadd.xlane.f32.xlu1 %v3598_v36 }
 0x3ec   : > { %1986 = vadd.xlane.f32.xlu0 %v3600_v6  ;;  %v1849_v5 = vpop.xlane.xlu1 %1848 }
 0x3ed   : > { %2816 = vpow2.f32 %v1940_v40  ;;  %v1889_v12 = vsub.f32 %v3504_v11, %v1849_v5  ;;  %v1942_v7 = vmul.f32 1.442695, %v1888_v10 }
 0x3ee   : > { %v3606_v14 = vpop.eup %2804  ;;  %2818 = vpow2.f32 %v1938_v3  ;;  %v1851_v44 = vpop.xlane.xlu0 %1850 }
 0x3ef   : > { %v3608_v16 = vpop.eup %2806  ;;  %v1944_v46 = vmul.f32 1.442695, %v1889_v12  ;;  %v1890_v49 = vsub.f32 %v3508_v13, %v1851_v44  ;;  %1992 = vadd.xlane.f32.xlu1 %v3606_v14 }
 0x3f0   : > { %1990 = vadd.xlane.f32.xlu0 %v3608_v16  ;;  %v1853_v9 = vpop.xlane.xlu1 %1852 }
 0x3f1   : > { %2820 = vpow2.f32 %v1944_v46  ;;  %v1891_v21 = vsub.f32 %v3512_v15, %v1853_v9  ;;  %v1946_v11 = vmul.f32 1.442695, %v1890_v49 }
 0x3f2   : > { %v3614_v24 = vpop.eup %2808  ;;  %2822 = vpow2.f32 %v1942_v7  ;;  %v1855_v57 = vpop.xlane.xlu0 %1854 }
 0x3f3   : > { %v3616_v48 = vpop.eup %2810  ;;  %v1948_v32 = vmul.f32 1.442695, %v1891_v21  ;;  %v1892_v33 = vsub.f32 %v3516_v17, %v1855_v57  ;;  %1996 = vadd.xlane.f32.xlu1 %v3614_v24 }
 0x3f4   : > { %1994 = vadd.xlane.f32.xlu0 %v3616_v48  ;;  %v1857_v13 = vpop.xlane.xlu1 %1856 }
 0x3f5   : > { %2824 = vpow2.f32 %v1948_v32  ;;  %v1893_v35 = vsub.f32 %v3520_v19, %v1857_v13  ;;  %v1950_v15 = vmul.f32 1.442695, %v1892_v33 }
 0x3f6   : > { %v3622_v37 = vpop.eup %2812  ;;  %2826 = vpow2.f32 %v1946_v11  ;;  %v1859_v53 = vpop.xlane.xlu0 %1858 }
 0x3f7   : > { %v3624_v39 = vpop.eup %2814  ;;  %v1952_v55 = vmul.f32 1.442695, %v1893_v35  ;;  %v1894_v43 = vsub.f32 %v3524_v20, %v1859_v53  ;;  %2000 = vadd.xlane.f32.xlu1 %v3622_v37 }
 0x3f8   : > { %1998 = vadd.xlane.f32.xlu0 %v3624_v39  ;;  %v1861_v17 = vpop.xlane.xlu1 %1860 }
 0x3f9   : > { %2828 = vpow2.f32 %v1952_v55  ;;  %v1895_v26 = vsub.f32 %v3528_v23, %v1861_v17  ;;  %v1954_v19 = vmul.f32 1.442695, %v1894_v43 }
 0x3fa   : > { %v3630_v47 = vpop.eup %2816  ;;  %2830 = vpow2.f32 %v1950_v15  ;;  %v1863_v58 = vpop.xlane.xlu0 %1862 }
 0x3fb   : > { %v3632_v50 = vpop.eup %2818  ;;  %v1956_v60 = vmul.f32 1.442695, %v1895_v26  ;;  %v1896_v28 = vsub.f32 %v3532_v25, %v1863_v58  ;;  %2004 = vadd.xlane.f32.xlu1 %v3630_v47 }
 0x3fc   : > { %2002 = vadd.xlane.f32.xlu0 %v3632_v50  ;;  %v1865_v20 = vpop.xlane.xlu1 %1864 }
 0x3fd   : > { %2832 = vpow2.f32 %v1956_v60  ;;  %v1897_v56 = vsub.f32 %v3536_v27, %v1865_v20  ;;  %v1958_v23 = vmul.f32 1.442695, %v1896_v28 }
 0x3fe   : > { %v3638_v59 = vpop.eup %2820  ;;  %2834 = vpow2.f32 %v1954_v19 }
 0x3ff   : > { %v3640_v61 = vpop.eup %2822  ;;  %v1960_v31 = vmul.f32 1.442695, %v1897_v56  ;;  %2008 = vadd.xlane.f32.xlu1 %v3638_v59 }
 0x400   : > { %2006 = vadd.xlane.f32.xlu0 %v3640_v61 }
 0x401   : > { %2836 = vpow2.f32 %v1960_v31 }
 0x402   : > { %v3644_v25 = vpop.eup %2824  ;;  %2838 = vpow2.f32 %v1958_v23 }
 0x403   : > { %v3646_v63 = vpop.eup %2826  ;;  %2012 = vadd.xlane.f32.xlu1 %v3644_v25 }
 0x404   : > { %2010 = vadd.xlane.f32.xlu0 %v3646_v63 }
 0x406   : > { %v3650_v27 = vpop.eup %2828 }
 0x407   : > { %v3652_v22 = vpop.eup %2830  ;;  %2016 = vadd.xlane.f32.xlu1 %v3650_v27 }
 0x408   : > { %2014 = vadd.xlane.f32.xlu0 %v3652_v22 }
 0x40a   : > { %v3656_v34 = vpop.eup %2832 }
 0x40b   : > { %v3658_v2 = vpop.eup %2834  ;;  %2020 = vadd.xlane.f32.xlu1 %v3656_v34 }
 0x40c   : > { %2018 = vadd.xlane.f32.xlu0 %v3658_v2 }
 0x40e   : > { %v3662_v1 = vpop.eup %2836 }
 0x40f   : > { %v3664_v4 = vpop.eup %2838  ;;  %2024 = vadd.xlane.f32.xlu1 %v3662_v1 }
 0x410   : > { %2022 = vadd.xlane.f32.xlu0 %v3664_v4 }
 0x458   : > { %v1965_v3 = vpop.xlane.xlu1 %1964 }
 0x459   : > { %2840 = vrcp.f32 %v1965_v3 }
 0x45c   : > { %v1969_v38 = vpop.xlane.xlu1 %1968 }
 0x45d   : > { %2842 = vrcp.f32 %v1969_v38  ;;  %v1963_v40 = vpop.xlane.xlu0 %1962 }
 0x45e   : > { %2844 = vrcp.f32 %v1963_v40 }
 0x461   : > { %v1967_v10 = vpop.xlane.xlu0 %1966 }
 0x462   : > { %2846 = vrcp.f32 %v1967_v10 }
 0x464   : > { %v1973_v5 = vpop.xlane.xlu1 %1972 }
 0x465   : > { %2848 = vrcp.f32 %v1973_v5  ;;  %v1971_v12 = vpop.xlane.xlu0 %1970 }
 0x466   : > { %v2841_v7 = vpop.eup %2840  ;;  %2850 = vrcp.f32 %v1971_v12 }
 0x467   : > { %v2059_v44 = vmul.f32 %v2841_v7, %v3548_v0 }
 0x468   : > { %v1977_v46 = vpop.xlane.xlu1 %1976 }
 0x469   : > { %2091 = vst [vmem:[%s3672_s14 + $0x8] sm:$0xff] %v2059_v44  ;;  %2852 = vrcp.f32 %v1977_v46  ;;  %v1975_v49 = vpop.xlane.xlu0 %1974 }
 0x46a   : > { %v2843_v9 = vpop.eup %2842  ;;  %2854 = vrcp.f32 %v1975_v49 }
 0x46b   : > { %v2845_v21 = vpop.eup %2844  ;;  %v2061_v11 = vmul.f32 %v2843_v9, %v3553_v8 }
 0x46c   : > { %v2058_v57 = vmul.f32 %v2845_v21, %v3555_v42  ;;  %v1981_v32 = vpop.xlane.xlu1 %1980 }
 0x46d   : > { %2093 = vst [vmem:[%s3672_s14 + $0x18] sm:$0xff] %v2061_v11  ;;  %2856 = vrcp.f32 %v1981_v32  ;;  %v1979_v0 = vpop.xlane.xlu0 %1978 }
 0x46e   : > { %2090 = vst [vmem:[%s3672_s14] sm:$0xff] %v2058_v57  ;;  %2858 = vrcp.f32 %v1979_v0 }
 0x46f   : > { %v2847_v33 = vpop.eup %2846 }
 0x470   : > { %v2060_v13 = vmul.f32 %v2847_v33, %v3561_v18  ;;  %v1985_v35 = vpop.xlane.xlu1 %1984 }
 0x471   : > { %2860 = vrcp.f32 %v1985_v35  ;;  %v1983_v15 = vpop.xlane.xlu0 %1982 }
 0x472   : > { %v2849_v53 = vpop.eup %2848  ;;  %2092 = vst [vmem:[%s3672_s14 + $0x10] sm:$0xff] %v2060_v13  ;;  %2862 = vrcp.f32 %v1983_v15 }
 0x473   : > { %v2851_v8 = vpop.eup %2850  ;;  %v2063_v42 = vmul.f32 %v2849_v53, %v3566_v29 }
 0x474   : > { %v2062_v55 = vmul.f32 %v2851_v8, %v3568_v51  ;;  %v1989_v43 = vpop.xlane.xlu1 %1988 }
 0x475   : > { %2095 = vst [vmem:[%s3672_s14 + $0x28] sm:$0xff] %v2063_v42  ;;  %2864 = vrcp.f32 %v1989_v43  ;;  %v1987_v17 = vpop.xlane.xlu0 %1986 }
 0x476   : > { %v2853_v26 = vpop.eup %2852  ;;  %2094 = vst [vmem:[%s3672_s14 + $0x20] sm:$0xff] %v2062_v55  ;;  %2866 = vrcp.f32 %v1987_v17 }
 0x477   : > { %v2855_v18 = vpop.eup %2854  ;;  %v2065_v19 = vmul.f32 %v2853_v26, %v3574_v41 }
 0x478   : > { %v2064_v58 = vmul.f32 %v2855_v18, %v3576_v45  ;;  %v1993_v60 = vpop.xlane.xlu1 %1992 }
 0x479   : > { %2097 = vst [vmem:[%s3672_s14 + $0x38] sm:$0xff] %v2065_v19  ;;  %2868 = vrcp.f32 %v1993_v60  ;;  %v1991_v29 = vpop.xlane.xlu0 %1990 }
 0x47a   : > { %v2857_v51 = vpop.eup %2856  ;;  %2096 = vst [vmem:[%s3672_s14 + $0x30] sm:$0xff] %v2064_v58  ;;  %2870 = vrcp.f32 %v1991_v29 }
 0x47b   : > { %v2859_v28 = vpop.eup %2858  ;;  %v2067_v20 = vmul.f32 %v2857_v51, %v3582_v52 }
 0x47c   : > { %v2066_v56 = vmul.f32 %v2859_v28, %v3584_v54  ;;  %v1997_v23 = vpop.xlane.xlu1 %1996 }
 0x47d   : > { %2099 = vst [vmem:[%s3672_s14 + $0x48] sm:$0xff] %v2067_v20  ;;  %2872 = vrcp.f32 %v1997_v23  ;;  %v1995_v41 = vpop.xlane.xlu0 %1994 }
 0x47e   : > { %v2861_v45 = vpop.eup %2860  ;;  %2098 = vst [vmem:[%s3672_s14 + $0x40] sm:$0xff] %v2066_v56  ;;  %2874 = vrcp.f32 %v1995_v41 }
 0x47f   : > { %v2863_v31 = vpop.eup %2862  ;;  %v2069_v3 = vmul.f32 %v2861_v45, %v3590_v30 }
 0x480   : > { %v2068_v38 = vmul.f32 %v2863_v31, %v3592_v62  ;;  %v2001_v40 = vpop.xlane.xlu1 %2000 }
 0x481   : > { %2101 = vst [vmem:[%s3672_s14 + $0x58] sm:$0xff] %v2069_v3  ;;  %2876 = vrcp.f32 %v2001_v40  ;;  %v1999_v52 = vpop.xlane.xlu0 %1998 }
 0x482   : > { %v2865_v54 = vpop.eup %2864  ;;  %2100 = vst [vmem:[%s3672_s14 + $0x50] sm:$0xff] %v2068_v38  ;;  %2878 = vrcp.f32 %v1999_v52 }
 0x483   : > { %v2867_v10 = vpop.eup %2866  ;;  %v2071_v5 = vmul.f32 %v2865_v54, %v3598_v36 }
 0x484   : > { %v2070_v12 = vmul.f32 %v2867_v10, %v3600_v6  ;;  %v2005_v7 = vpop.xlane.xlu1 %2004 }
 0x485   : > { %2103 = vst [vmem:[%s3672_s14 + $0x68] sm:$0xff] %v2071_v5  ;;  %2880 = vrcp.f32 %v2005_v7  ;;  %v2003_v30 = vpop.xlane.xlu0 %2002 }
 0x486   : > { %v2869_v62 = vpop.eup %2868  ;;  %2102 = vst [vmem:[%s3672_s14 + $0x60] sm:$0xff] %v2070_v12  ;;  %2882 = vrcp.f32 %v2003_v30 }
 0x487   : > { %v2871_v44 = vpop.eup %2870  ;;  %v2073_v46 = vmul.f32 %v2869_v62, %v3606_v14 }
 0x488   : > { %v2072_v49 = vmul.f32 %v2871_v44, %v3608_v16  ;;  %v2009_v9 = vpop.xlane.xlu1 %2008 }
 0x489   : > { %2105 = vst [vmem:[%s3672_s14 + $0x78] sm:$0xff] %v2073_v46  ;;  %2884 = vrcp.f32 %v2009_v9  ;;  %v2007_v36 = vpop.xlane.xlu0 %2006 }
 0x48a   : > { %v2873_v6 = vpop.eup %2872  ;;  %2104 = vst [vmem:[%s3672_s14 + $0x70] sm:$0xff] %v2072_v49  ;;  %2886 = vrcp.f32 %v2007_v36 }
 0x48b   : > { %v2875_v21 = vpop.eup %2874  ;;  %v2075_v11 = vmul.f32 %v2873_v6, %v3614_v24 }
 0x48c   : > { %v2074_v57 = vmul.f32 %v2875_v21, %v3616_v48  ;;  %v2013_v32 = vpop.xlane.xlu1 %2012 }
 0x48d   : > { %2107 = vst [vmem:[%s3672_s14 + $0x88] sm:$0xff] %v2075_v11  ;;  %2888 = vrcp.f32 %v2013_v32  ;;  %v2011_v14 = vpop.xlane.xlu0 %2010 }
 0x48e   : > { %v2877_v16 = vpop.eup %2876  ;;  %2106 = vst [vmem:[%s3672_s14 + $0x80] sm:$0xff] %v2074_v57  ;;  %2890 = vrcp.f32 %v2011_v14 }
 0x48f   : > { %v2879_v0 = vpop.eup %2878  ;;  %v2077_v33 = vmul.f32 %v2877_v16, %v3622_v37 }
 0x490   : > { %v2076_v13 = vmul.f32 %v2879_v0, %v3624_v39  ;;  %v2017_v35 = vpop.xlane.xlu1 %2016 }
 0x491   : > { %2109 = vst [vmem:[%s3672_s14 + $0x98] sm:$0xff] %v2077_v33  ;;  %2892 = vrcp.f32 %v2017_v35  ;;  %v2015_v24 = vpop.xlane.xlu0 %2014 }
 0x492   : > { %v2881_v48 = vpop.eup %2880  ;;  %2108 = vst [vmem:[%s3672_s14 + $0x90] sm:$0xff] %v2076_v13  ;;  %2894 = vrcp.f32 %v2015_v24 }
 0x493   : > { %v2883_v15 = vpop.eup %2882  ;;  %v2079_v53 = vmul.f32 %v2881_v48, %v3630_v47 }
 0x494   : > { %v2078_v8 = vmul.f32 %v2883_v15, %v3632_v50  ;;  %v2021_v42 = vpop.xlane.xlu1 %2020 }
 0x495   : > { %2111 = vst [vmem:[%s3672_s14 + $0xa8] sm:$0xff] %v2079_v53  ;;  %2896 = vrcp.f32 %v2021_v42  ;;  %v2019_v37 = vpop.xlane.xlu0 %2018 }
 0x496   : > { %v2885_v39 = vpop.eup %2884  ;;  %2110 = vst [vmem:[%s3672_s14 + $0xa0] sm:$0xff] %v2078_v8  ;;  %2898 = vrcp.f32 %v2019_v37 }
 0x497   : > { %v2887_v55 = vpop.eup %2886  ;;  %v2081_v43 = vmul.f32 %v2885_v39, %v3638_v59 }
 0x498   : > { %v2080_v17 = vmul.f32 %v2887_v55, %v3640_v61  ;;  %v2025_v26 = vpop.xlane.xlu1 %2024 }
 0x499   : > { %2113 = vst [vmem:[%s3672_s14 + $0xb8] sm:$0xff] %v2081_v43  ;;  %2900 = vrcp.f32 %v2025_v26  ;;  %v2023_v47 = vpop.xlane.xlu0 %2022 }
 0x49a   : > { %v2889_v50 = vpop.eup %2888  ;;  %2112 = vst [vmem:[%s3672_s14 + $0xb0] sm:$0xff] %v2080_v17  ;;  %2902 = vrcp.f32 %v2023_v47 }
 0x49b   : > { %v2891_v18 = vpop.eup %2890  ;;  %v2083_v19 = vmul.f32 %v2889_v50, %v3644_v25 }
 0x49c   : > { %v2082_v58 = vmul.f32 %v2891_v18, %v3646_v63 }
 0x49d   : > { %2115 = vst [vmem:[%s3672_s14 + $0xc8] sm:$0xff] %v2083_v19 }
 0x49e   : > { %v2893_v59 = vpop.eup %2892  ;;  %2114 = vst [vmem:[%s3672_s14 + $0xc0] sm:$0xff] %v2082_v58 }
 0x49f   : > { %v2895_v61 = vpop.eup %2894  ;;  %v2085_v60 = vmul.f32 %v2893_v59, %v3650_v27 }
 0x4a0   : > { %v2084_v29 = vmul.f32 %v2895_v61, %v3652_v22 }
 0x4a1   : > { %2117 = vst [vmem:[%s3672_s14 + $0xd8] sm:$0xff] %v2085_v60 }
 0x4a2   : > { %v2897_v51 = vpop.eup %2896  ;;  %2116 = vst [vmem:[%s3672_s14 + $0xd0] sm:$0xff] %v2084_v29 }
 0x4a3   : > { %v2899_v28 = vpop.eup %2898  ;;  %v2087_v25 = vmul.f32 %v2897_v51, %v3656_v34 }
 0x4a4   : > { %v2086_v63 = vmul.f32 %v2899_v28, %v3658_v2 }
 0x4a5   : > { %2119 = vst [vmem:[%s3672_s14 + $0xe8] sm:$0xff] %v2087_v25 }
 0x4a6   : > { %v2901_v20 = vpop.eup %2900  ;;  %2118 = vst [vmem:[%s3672_s14 + $0xe0] sm:$0xff] %v2086_v63 }
 0x4a7   : > { %v2903_v27 = vpop.eup %2902  ;;  %v2089_v22 = vmul.f32 %v2901_v20, %v3662_v1 }
 0x4a8   : > { %v2088_v34 = vmul.f32 %v2903_v27, %v3664_v4 }
 0x4a9   : > { %2121 = vst [vmem:[%s3672_s14 + $0xf8] sm:$0xff] %v2089_v22 }
 0x4aa   : > { %2120 = vst [vmem:[%s3672_s14 + $0xf0] sm:$0xff] %v2088_v34 }
 0x4ab   : > { %2917 = shalt.err (!%p2914_p3)
}
 0x4ac   : > { %s2918_s28 = scalar_lea.hbm %s3739_s24, 4096  ;;  %s2922_s16 = scalar_lea.hbm %s3797_s9, 16384 }
 0x4ad   : > { %p2919_p4 = scmp.ne.s32.totalorder %s3739_s24, %s2918_s28  ;;  %p2923_p9 = scmp.lt.s32.totalorder %s3739_s24, %s3797_s9 }
 0x4ae   : > { %p2924_p10 = scmp.lt.s32.totalorder %s2922_s16, %s2918_s28 }
 0x4af   : > { %p2920_p7 = pnand %p2919_p4, %p3057_p5 }
 0x4b0   : > { %p2925_p11 = por %p2924_p10, %p2923_p9 }
 0x4b1   : > { %p2921_p8 = pneg %p2920_p7 }
 0x4b3   : > { %p2926_p12 = pnand %p2925_p11, %p2921_p8 }
 0x4b5   : > { %2929 = shalt.err (!%p2926_p12)
}
 0x4b6   : > { %s2967_s23 = smov 128   ;;  %s2968_s25 = smov 8  }
 0x4b7   : > { %2735 = dma.vmem_to_hbm [thread:$0]  (%p3057_p5), %s3741_s17, 4096, %s3739_s24, %s3748_s13, %s2967_s23, %s2967_s23, %s2968_s25  }
 0x4b8 PF: > { %p2741_p13 = scmp.ge.s32.totalorder %s2964_s12, 2  ;;  %s2151_s26 = sand.u32 1, %s2952_s30  }
 0x4b9   : > { %s2152_s27 = scalar_lea.sflag [#allocation3], %s2151_s26 }
 0x4ba   : > { %p2738_p0 = pnand %p2741_p13, %p3061_p6 }
 0x4bc   : > { %p2739_p1 = pneg %p2738_p0 }
 0x4be   : > { %2947 = dma.done.wait (%p2739_p1), %s2152_s27, 4096  }
 0x4bf   : > { %2949 = vsyncadd (%p2739_p1), %s2152_s27, 4294963200  ;;  %p19_p2 = scmp.ge.s32.totalorder %s3044_s15, 6   ;;  %s3800_s30 = smov %s2956_s10 }
 0x4c0   : > { %s3801_s10 = smov %s2960_s11  ;;  %s3802_s11 = smov %s3055_s18 }
 0x4c1   : > { %s3803_s12 = smov %s3044_s15  ;;  %21 = sbr.rel (!%p19_p2) target bundleno = 3 (0x3), region = 91 }
 0x4c6   :  { %2157 = vsyncpa [#allocation3], 1 }
 0x4c7   :  { %2159 = vsyncpa [#allocation3 + $0x1], 1 }

</bundles_post_ra>
